<compile_context>
chip_gen: v6e
topology: v6e:2x2x1
jax: 0.10.0
libtpu: 0.0.40
codegen_flags: <defaults>
</compile_context>

<pallas_src>
import functools

import jax
import jax.numpy as jnp
from jax import lax
from jax.experimental import pallas as pl
from jax.experimental.pallas import tpu as pltpu


def _make_gru_kernel(num_layers, hidden_size, batch_pad, time_block, seq_len):
    L, H, Bp, TB, T = num_layers, hidden_size, batch_pad, time_block, seq_len

    def kernel(*refs):
        # refs = [x (TB*Bp, I),
        #         per layer: w_ih (I_l, 3H), w_hh (H, 3H), b_gi (1, 3H), b_hn (1, H),
        #         fc_w (H, O), fc_b (1, O),
        #         out (Bp, O),
        #         scratch: h (L, Bp, H), seq_a (TB*Bp, H), seq_b (TB*Bp, H),
        #                  gi (TB*Bp, 3H)]
        x_ref = refs[0]
        layer_refs = refs[1:1 + 4 * L]
        fc_w_ref = refs[1 + 4 * L]
        fc_b_ref = refs[2 + 4 * L]
        out_ref = refs[3 + 4 * L]
        h_ref, seq_a_ref, seq_b_ref, gi_ref = refs[4 + 4 * L:]

        tb = pl.program_id(0)

        # h0 = zeros(L, Bp, H), once at the first time block.
        @pl.when(tb == 0)
        def _():
            h_ref[...] = jnp.zeros_like(h_ref)

        seq_bufs = (seq_a_ref, seq_b_ref)

        for l in range(L):
            w_ih_ref = layer_refs[4 * l]        # (I_l, 3H)  gate-concat along lanes
            w_hh_ref = layer_refs[4 * l + 1]    # (H,   3H)
            b_gi_ref = layer_refs[4 * l + 2]    # (1,   3H) = [b_ir+b_hr | b_iz+b_hz | b_in]
            b_hn_ref = layer_refs[4 * l + 3]    # (1,    H) = b_hn

            # Input to this layer for the whole time block (time-major, flattened).
            # Ping-pong buffers: layer l reads buf[(l-1)%2], writes buf[l%2].
            inp2d = x_ref[...] if l == 0 else seq_bufs[(l - 1) % 2][...]

            # Hoisted, non-recurrent path: ONE fused (TB*Bp, I_l) x (I_l, 3H) GEMM
            # covering all three gates over all TB timesteps, biases pre-folded.
            gi_ref[...] = (jnp.dot(inp2d, w_ih_ref[...],
                                   preferred_element_type=jnp.float32)
                           + b_gi_ref[...])

            # Recurrent path: weights / bias hoisted out of the sequential loop.
            w_hh = w_hh_ref[...]
            b_hn = b_hn_ref[...]
            last_layer = (l == L - 1)
            out_seq_ref = None if last_layer else seq_bufs[l % 2]

            def step(t, h):
                rows = pl.ds(pl.multiple_of(t * Bp, Bp), Bp)   # 8-sublane aligned
                gi = gi_ref[rows]                              # (Bp, 3H)
                # One fused recurrent matmul on the serial dependency chain.
                gh = jnp.dot(h, w_hh, preferred_element_type=jnp.float32)
                rz = jax.nn.sigmoid(gi[:, :2 * H] + gh[:, :2 * H])
                r = rz[:, :H]
                z = rz[:, H:]
                n = jnp.tanh(gi[:, 2 * H:] + r * (gh[:, 2 * H:] + b_hn))
                h_new = n + z * (h - n)            # == (1 - z) * n + z * h
                if T % TB != 0:                    # only traced when time is padded
                    h_new = jnp.where(tb * TB + t < T, h_new, h)
                if out_seq_ref is not None:
                    out_seq_ref[rows] = h_new      # becomes next layer's input
                return h_new

            h_ref[l] = lax.fori_loop(0, TB, step, h_ref[l], unroll=min(TB, 8))

        # Final FC on the last timestep's top-layer hidden state (== final h).
        @pl.when(tb == pl.num_programs(0) - 1)
        def _():
            out_ref[...] = (jnp.dot(h_ref[L - 1], fc_w_ref[...],
                                    preferred_element_type=jnp.float32)
                            + fc_b_ref[...])

    return kernel


def gru_model_forward(x, params, *, num_layers, hidden_size, output_size,
                      time_block=None, param_dtype=jnp.float32):
    """x: (B, T, I) float32 (batch_first).  params: PyTorch-layout GRU + FC weights."""
    B, T, I = x.shape
    H, O, L = hidden_size, output_size, num_layers

    # Pad the per-timestep row count to a sublane multiple so every in-loop
    # gi load / seq store is (8,128)-tile aligned.
    Bp = -(-B // 8) * 8

    if time_block is None:
        time_block = T if T <= 64 else 64
    TB = int(time_block)
    n_blocks = -(-T // TB)
    T_pad = n_blocks * TB

    # Time-major, batch-padded, flattened to (T_pad*Bp, I): each grid step gets
    # one lane-dense slab.
    x_tm = jnp.transpose(x, (1, 0, 2))                          # (T, B, I)
    x_tm = jnp.pad(x_tm, ((0, T_pad - T), (0, Bp - B), (0, 0)))
    x2d = x_tm.reshape(T_pad * Bp, I)

    def _const_spec(arr):
        # Grid-invariant full-array block.
        return pl.BlockSpec(arr.shape, lambda t: (0, 0))

    inputs = [x2d]
    in_specs = [pl.BlockSpec((TB * Bp, I), lambda t: (t, 0))]

    for l in range(L):
        in_l = I if l == 0 else H
        w_ih = params[f"weight_ih_l{l}"]                        # (3H, in_l), gate order r,z,n
        w_hh = params[f"weight_hh_l{l}"]                        # (3H, H)
        b_ih = params[f"bias_ih_l{l}"].reshape(3, H)
        b_hh = params[f"bias_hh_l{l}"].reshape(3, H)

        # Lane-concatenated, transposed gate weights for fused GEMMs.
        w_ih_c = w_ih.T.astype(param_dtype)                     # (in_l, 3H)
        w_hh_c = w_hh.T.astype(param_dtype)                     # (H,    3H)
        # Folded biases: r/z carry b_ih+b_hh, n carries b_ih only; b_hn kept
        # separate (it sits inside r * (...) in the GRU cell).
        b_gi = jnp.concatenate([b_ih[0] + b_hh[0],
                                b_ih[1] + b_hh[1],
                                b_ih[2]], axis=0).reshape(1, 3 * H).astype(jnp.float32)
        b_hn = b_hh[2].reshape(1, H).astype(jnp.float32)
        for arr in (w_ih_c, w_hh_c, b_gi, b_hn):
            inputs.append(arr)
            in_specs.append(_const_spec(arr))

    fc_w_t = params["fc_weight"].T.astype(param_dtype)          # (H, O)
    fc_b = params["fc_bias"].reshape(1, -1).astype(jnp.float32) # (1, O)
    for arr in (fc_w_t, fc_b):
        inputs.append(arr)
        in_specs.append(_const_spec(arr))

    # Explicit VMEM budget: inputs are double-buffered by the default pipeline,
    # scratch is single-instance.  Clamp to 64 MiB so the same budget is valid
    # on v7x; at these shapes the estimate is well under every chip's limit.
    itemsize = jnp.dtype(jnp.float32).itemsize
    weight_bytes = sum(int(a.size) * a.dtype.itemsize for a in inputs[1:])
    scratch_bytes = (L * Bp * H + 2 * TB * Bp * H + TB * Bp * 3 * H) * itemsize
    vmem_est = (2 * TB * Bp * I * itemsize      # x time-block (double-buffered)
                + 2 * weight_bytes              # weights / biases (double-buffered)
                + 2 * Bp * O * itemsize         # output block
                + scratch_bytes)
    vmem_limit = int(min(max(2 * vmem_est, 8 * 2 ** 20), 64 * 2 ** 20))

    kernel = _make_gru_kernel(L, H, Bp, TB, T)

    out = pl.pallas_call(
        kernel,
        out_shape=jax.ShapeDtypeStruct((Bp, O), jnp.float32),
        grid_spec=pltpu.PrefetchScalarGridSpec(
            num_scalar_prefetch=0,
            grid=(n_blocks,),
            in_specs=in_specs,
            out_specs=pl.BlockSpec((Bp, O), lambda t: (0, 0)),
            scratch_shapes=[
                pltpu.VMEM((L, Bp, H), jnp.float32),        # hidden state per layer
                pltpu.VMEM((TB * Bp, H), jnp.float32),      # layer output seq (ping)
                pltpu.VMEM((TB * Bp, H), jnp.float32),      # layer output seq (pong)
                pltpu.VMEM((TB * Bp, 3 * H), jnp.float32),  # fused gate scratch
            ],
        ),
        compiler_params=pltpu.CompilerParams(
            dimension_semantics=("arbitrary",),             # recurrence across blocks
            vmem_limit_bytes=vmem_limit),
    )(*inputs)
    return out[:B]


def gru_model_reference(x, params, *, num_layers, hidden_size):
    """Pure-JAX reference (matches torch.nn.GRU batch_first + fc(out[:, -1, :]))."""
    B, T, I = x.shape
    H = hidden_size
    h = jnp.zeros((num_layers, B, H), jnp.float32)
    inp_seq = x
    for l in range(num_layers):
        w_ih = params[f"weight_ih_l{l}"]
        w_hh = params[f"weight_hh_l{l}"]
        b_ih = params[f"bias_ih_l{l}"]
        b_hh = params[f"bias_hh_l{l}"]

        def cell(h_prev, x_t):
            gi = x_t @ w_ih.T + b_ih
            gh = h_prev @ w_hh.T + b_hh
            i_r, i_z, i_n = jnp.split(gi, 3, axis=-1)
            h_r, h_z, h_n = jnp.split(gh, 3, axis=-1)
            r = jax.nn.sigmoid(i_r + h_r)
            z = jax.nn.sigmoid(i_z + h_z)
            n = jnp.tanh(i_n + r * h_n)
            h_new = (1.0 - z) * n + z * h_prev
            return h_new, h_new

        _, outs = jax.lax.scan(cell, h[l], jnp.transpose(inp_seq, (1, 0, 2)))
        inp_seq = jnp.transpose(outs, (1, 0, 2))
    last = inp_seq[:, -1, :]
    return last @ params["fc_weight"].T + params["fc_bias"]


def init_params(key, input_size, hidden_size, output_size, num_layers):
    H = hidden_size
    bound = 1.0 / jnp.sqrt(jnp.float32(H))
    params = {}
    for l in range(num_layers):
        in_l = input_size if l == 0 else H
        key, k1, k2, k3, k4 = jax.random.split(key, 5)
        params[f"weight_ih_l{l}"] = jax.random.uniform(k1, (3 * H, in_l), jnp.float32, -bound, bound)
        params[f"weight_hh_l{l}"] = jax.random.uniform(k2, (3 * H, H), jnp.float32, -bound, bound)
        params[f"bias_ih_l{l}"] = jax.random.uniform(k3, (3 * H,), jnp.float32, -bound, bound)
        params[f"bias_hh_l{l}"] = jax.random.uniform(k4, (3 * H,), jnp.float32, -bound, bound)
    key, k5, k6 = jax.random.split(key, 3)
    params["fc_weight"] = jax.random.uniform(k5, (output_size, H), jnp.float32, -bound, bound)
    params["fc_bias"] = jax.random.uniform(k6, (output_size,), jnp.float32, -bound, bound)
    return params


if __name__ == "__main__":
    # Small shapes consistent with the module's forward.
    B, T, I, H, O, L = 2, 8, 16, 32, 8, 2

    key = jax.random.PRNGKey(0)
    key, kx = jax.random.split(key)
    x = jax.random.normal(kx, (B, T, I), jnp.float32)
    params = init_params(key, I, H, O, L)

    run = jax.jit(functools.partial(gru_model_forward, num_layers=L,
                                    hidden_size=H, output_size=O))
    out = jax.block_until_ready(run(x, params))

    ref = gru_model_reference(x, params, num_layers=L, hidden_size=H)
    assert out.shape == (B, O)
    assert jnp.allclose(out, ref, atol=1e-5, rtol=1e-5), "mismatch vs JAX reference"

    print("KERNEL_OK")
</pallas_src>

<mosaic_0001>
module attributes {stable_mosaic.version = 11 : i64} {
  func.func @kernel(%arg0: i32, %arg1: memref<64x16xf32, #tpu.memory_space<vmem>>, %arg2: memref<16x96xf32, #tpu.memory_space<vmem>>, %arg3: memref<32x96xf32, #tpu.memory_space<vmem>>, %arg4: memref<1x96xf32, #tpu.memory_space<vmem>>, %arg5: memref<1x32xf32, #tpu.memory_space<vmem>>, %arg6: memref<32x96xf32, #tpu.memory_space<vmem>>, %arg7: memref<32x96xf32, #tpu.memory_space<vmem>>, %arg8: memref<1x96xf32, #tpu.memory_space<vmem>>, %arg9: memref<1x32xf32, #tpu.memory_space<vmem>>, %arg10: memref<32x8xf32, #tpu.memory_space<vmem>>, %arg11: memref<1x8xf32, #tpu.memory_space<vmem>>, %arg12: memref<8x8xf32, #tpu.memory_space<vmem>>, %arg13: memref<2x8x32xf32, #tpu.memory_space<vmem>>, %arg14: memref<64x32xf32, #tpu.memory_space<vmem>>, %arg15: memref<64x32xf32, #tpu.memory_space<vmem>>, %arg16: memref<64x96xf32, #tpu.memory_space<vmem>>) attributes {dimension_semantics = [#tpu.dimension_semantics<arbitrary>], iteration_bounds = array<i64: 1>, scalar_prefetch = 0 : i64, scratch_operands = 4 : i64, tpu.core_type = #tpu.core_type<tc>, window_params = [{transform_indices = @transform_0, window_bounds = array<i64: 64, 16>}, {pipeline_mode = #tpu.pipeline_mode<synchronous>, transform_indices = @transform_1, window_bounds = array<i64: 16, 96>}, {pipeline_mode = #tpu.pipeline_mode<synchronous>, transform_indices = @transform_2, window_bounds = array<i64: 32, 96>}, {pipeline_mode = #tpu.pipeline_mode<synchronous>, transform_indices = @transform_3, window_bounds = array<i64: 1, 96>}, {pipeline_mode = #tpu.pipeline_mode<synchronous>, transform_indices = @transform_4, window_bounds = array<i64: 1, 32>}, {pipeline_mode = #tpu.pipeline_mode<synchronous>, transform_indices = @transform_5, window_bounds = array<i64: 32, 96>}, {pipeline_mode = #tpu.pipeline_mode<synchronous>, transform_indices = @transform_6, window_bounds = array<i64: 32, 96>}, {pipeline_mode = #tpu.pipeline_mode<synchronous>, transform_indices = @transform_7, window_bounds = array<i64: 1, 96>}, {pipeline_mode = #tpu.pipeline_mode<synchronous>, transform_indices = @transform_8, window_bounds = array<i64: 1, 32>}, {pipeline_mode = #tpu.pipeline_mode<synchronous>, transform_indices = @transform_9, window_bounds = array<i64: 32, 8>}, {pipeline_mode = #tpu.pipeline_mode<synchronous>, transform_indices = @transform_10, window_bounds = array<i64: 1, 8>}, {pipeline_mode = #tpu.pipeline_mode<synchronous>, transform_indices = @transform_11, window_bounds = array<i64: 8, 8>}]} {
    %c0_i32 = arith.constant 0 : i32
    %0 = arith.cmpi eq, %arg0, %c0_i32 : i32
    %1 = arith.extui %0 : i1 to i32
    %c0_i32_0 = arith.constant 0 : i32
    %2 = arith.cmpi ne, %1, %c0_i32_0 : i32
    scf.if %2 {
      %cst_120 = arith.constant 0.000000e+00 : f32
      %450 = vector.broadcast %cst_120 : f32 to vector<2x8x32xf32>
      %c0_121 = arith.constant 0 : index
      %c0_122 = arith.constant 0 : index
      %c0_123 = arith.constant 0 : index
      %451 = vector.load %arg13[%c0_121, %c0_122, %c0_123] : memref<2x8x32xf32, #tpu.memory_space<vmem>>, vector<2x8x32xf32>
      tpu.vector_store %arg13[%c0_121, %c0_122, %c0_123], %450 {strides = array<i32>} : memref<2x8x32xf32, #tpu.memory_space<vmem>>, vector<2x8x32xf32>,
    } else {
    }
    %c0 = arith.constant 0 : index
    %c0_1 = arith.constant 0 : index
    %3 = vector.load %arg1[%c0, %c0_1] : memref<64x16xf32, #tpu.memory_space<vmem>>, vector<64x16xf32>
    %c0_2 = arith.constant 0 : index
    %c0_3 = arith.constant 0 : index
    %4 = vector.load %arg2[%c0_2, %c0_3] : memref<16x96xf32, #tpu.memory_space<vmem>>, vector<16x96xf32>
    %cst = arith.constant dense<0.000000e+00> : vector<64x96xf32>
    %5 = tpu.matmul %3, %4, %cst {dimension_numbers = #tpu.dot_dimension_numbers<[1], [0], [0], [1], [0, 0, 1, 1], [], []>} : vector<64x16xf32>, vector<16x96xf32>, vector<64x96xf32> -> vector<64x96xf32>
    %c0_4 = arith.constant 0 : index
    %c0_5 = arith.constant 0 : index
    %6 = vector.load %arg4[%c0_4, %c0_5] : memref<1x96xf32, #tpu.memory_space<vmem>>, vector<1x96xf32>
    %7 = vector.broadcast %6 : vector<1x96xf32> to vector<64x96xf32>
    %8 = arith.addf %5, %7 : vector<64x96xf32>
    %c0_6 = arith.constant 0 : index
    %c0_7 = arith.constant 0 : index
    %9 = vector.load %arg16[%c0_6, %c0_7] : memref<64x96xf32, #tpu.memory_space<vmem>>, vector<64x96xf32>
    tpu.vector_store %arg16[%c0_6, %c0_7], %8 {strides = array<i32>} : memref<64x96xf32, #tpu.memory_space<vmem>>, vector<64x96xf32>,
    %c0_8 = arith.constant 0 : index
    %c0_9 = arith.constant 0 : index
    %10 = vector.load %arg3[%c0_8, %c0_9] : memref<32x96xf32, #tpu.memory_space<vmem>>, vector<32x96xf32>
    %c0_10 = arith.constant 0 : index
    %c0_11 = arith.constant 0 : index
    %11 = vector.load %arg5[%c0_10, %c0_11] : memref<1x32xf32, #tpu.memory_space<vmem>>, vector<1x32xf32>
    %c0_12 = arith.constant 0 : index
    %c0_13 = arith.constant 0 : index
    %c0_14 = arith.constant 0 : index
    %12 = vector.load %arg13[%c0_12, %c0_13, %c0_14] : memref<2x8x32xf32, #tpu.memory_space<vmem>>, vector<1x8x32xf32>
    %13 = vector.shape_cast %12 : vector<1x8x32xf32> to vector<8x32xf32>
    %c0_i32_15 = arith.constant 0 : i32
    %c8_i32 = arith.constant 8 : i32
    %14 = arith.muli %c0_i32_15, %c8_i32 : i32
    %15 = tpu.assume_multiple %14, 8 : i32
    %16 = arith.index_cast %15 : i32 to index
    %c0_16 = arith.constant 0 : index
    %17 = vector.load %arg16[%16, %c0_16] : memref<64x96xf32, #tpu.memory_space<vmem>>, vector<8x96xf32>
    %cst_17 = arith.constant dense<0.000000e+00> : vector<8x96xf32>
    %18 = tpu.matmul %13, %10, %cst_17 {dimension_numbers = #tpu.dot_dimension_numbers<[1], [0], [0], [1], [0, 0, 1, 1], [], []>} : vector<8x32xf32>, vector<32x96xf32>, vector<8x96xf32> -> vector<8x96xf32>
    %19 = vector.extract_strided_slice %17 {offsets = [0, 0], sizes = [8, 64], strides = [1, 1]} : vector<8x96xf32> to vector<8x64xf32>
    %20 = vector.extract_strided_slice %18 {offsets = [0, 0], sizes = [8, 64], strides = [1, 1]} : vector<8x96xf32> to vector<8x64xf32>
    %21 = arith.addf %19, %20 : vector<8x64xf32>
    %22 = arith.negf %21 : vector<8x64xf32>
    %23 = math.exp %22 : vector<8x64xf32>
    %cst_18 = arith.constant 1.000000e+00 : f32
    %24 = vector.broadcast %cst_18 : f32 to vector<8x64xf32>
    %25 = arith.addf %24, %23 : vector<8x64xf32>
    %26 = arith.divf %24, %25 : vector<8x64xf32>
    %27 = vector.extract_strided_slice %26 {offsets = [0, 0], sizes = [8, 32], strides = [1, 1]} : vector<8x64xf32> to vector<8x32xf32>
    %28 = vector.extract_strided_slice %26 {offsets = [0, 32], sizes = [8, 32], strides = [1, 1]} : vector<8x64xf32> to vector<8x32xf32>
    %29 = vector.extract_strided_slice %17 {offsets = [0, 64], sizes = [8, 32], strides = [1, 1]} : vector<8x96xf32> to vector<8x32xf32>
    %30 = vector.extract_strided_slice %18 {offsets = [0, 64], sizes = [8, 32], strides = [1, 1]} : vector<8x96xf32> to vector<8x32xf32>
    %31 = vector.broadcast %11 : vector<1x32xf32> to vector<8x32xf32>
    %32 = arith.addf %30, %31 : vector<8x32xf32>
    %33 = arith.mulf %27, %32 : vector<8x32xf32>
    %34 = arith.addf %29, %33 : vector<8x32xf32>
    %35 = math.tanh %34 : vector<8x32xf32>
    %36 = arith.subf %13, %35 : vector<8x32xf32>
    %37 = arith.mulf %28, %36 : vector<8x32xf32>
    %38 = arith.addf %35, %37 : vector<8x32xf32>
    %39 = arith.index_cast %15 : i32 to index
    %c0_19 = arith.constant 0 : index
    %40 = vector.load %arg14[%39, %c0_19] : memref<64x32xf32, #tpu.memory_space<vmem>>, vector<8x32xf32>
    tpu.vector_store %arg14[%39, %c0_19], %38 {strides = array<i32>} : memref<64x32xf32, #tpu.memory_space<vmem>>, vector<8x32xf32>,
    %c1_i32 = arith.constant 1 : i32
    %c8_i32_20 = arith.constant 8 : i32
    %41 = arith.muli %c1_i32, %c8_i32_20 : i32
    %42 = tpu.assume_multiple %41, 8 : i32
    %43 = arith.index_cast %42 : i32 to index
    %c0_21 = arith.constant 0 : index
    %44 = vector.load %arg16[%43, %c0_21] : memref<64x96xf32, #tpu.memory_space<vmem>>, vector<8x96xf32>
    %cst_22 = arith.constant dense<0.000000e+00> : vector<8x96xf32>
    %45 = tpu.matmul %38, %10, %cst_22 {dimension_numbers = #tpu.dot_dimension_numbers<[1], [0], [0], [1], [0, 0, 1, 1], [], []>} : vector<8x32xf32>, vector<32x96xf32>, vector<8x96xf32> -> vector<8x96xf32>
    %46 = vector.extract_strided_slice %44 {offsets = [0, 0], sizes = [8, 64], strides = [1, 1]} : vector<8x96xf32> to vector<8x64xf32>
    %47 = vector.extract_strided_slice %45 {offsets = [0, 0], sizes = [8, 64], strides = [1, 1]} : vector<8x96xf32> to vector<8x64xf32>
    %48 = arith.addf %46, %47 : vector<8x64xf32>
    %49 = arith.negf %48 : vector<8x64xf32>
    %50 = math.exp %49 : vector<8x64xf32>
    %cst_23 = arith.constant 1.000000e+00 : f32
    %51 = vector.broadcast %cst_23 : f32 to vector<8x64xf32>
    %52 = arith.addf %51, %50 : vector<8x64xf32>
    %53 = arith.divf %51, %52 : vector<8x64xf32>
    %54 = vector.extract_strided_slice %53 {offsets = [0, 0], sizes = [8, 32], strides = [1, 1]} : vector<8x64xf32> to vector<8x32xf32>
    %55 = vector.extract_strided_slice %53 {offsets = [0, 32], sizes = [8, 32], strides = [1, 1]} : vector<8x64xf32> to vector<8x32xf32>
    %56 = vector.extract_strided_slice %44 {offsets = [0, 64], sizes = [8, 32], strides = [1, 1]} : vector<8x96xf32> to vector<8x32xf32>
    %57 = vector.extract_strided_slice %45 {offsets = [0, 64], sizes = [8, 32], strides = [1, 1]} : vector<8x96xf32> to vector<8x32xf32>
    %58 = vector.broadcast %11 : vector<1x32xf32> to vector<8x32xf32>
    %59 = arith.addf %57, %58 : vector<8x32xf32>
    %60 = arith.mulf %54, %59 : vector<8x32xf32>
    %61 = arith.addf %56, %60 : vector<8x32xf32>
    %62 = math.tanh %61 : vector<8x32xf32>
    %63 = arith.subf %38, %62 : vector<8x32xf32>
    %64 = arith.mulf %55, %63 : vector<8x32xf32>
    %65 = arith.addf %62, %64 : vector<8x32xf32>
    %66 = arith.index_cast %42 : i32 to index
    %c0_24 = arith.constant 0 : index
    %67 = vector.load %arg14[%66, %c0_24] : memref<64x32xf32, #tpu.memory_space<vmem>>, vector<8x32xf32>
    tpu.vector_store %arg14[%66, %c0_24], %65 {strides = array<i32>} : memref<64x32xf32, #tpu.memory_space<vmem>>, vector<8x32xf32>,
    %c2_i32 = arith.constant 2 : i32
    %c8_i32_25 = arith.constant 8 : i32
    %68 = arith.muli %c2_i32, %c8_i32_25 : i32
    %69 = tpu.assume_multiple %68, 8 : i32
    %70 = arith.index_cast %69 : i32 to index
    %c0_26 = arith.constant 0 : index
    %71 = vector.load %arg16[%70, %c0_26] : memref<64x96xf32, #tpu.memory_space<vmem>>, vector<8x96xf32>
    %cst_27 = arith.constant dense<0.000000e+00> : vector<8x96xf32>
    %72 = tpu.matmul %65, %10, %cst_27 {dimension_numbers = #tpu.dot_dimension_numbers<[1], [0], [0], [1], [0, 0, 1, 1], [], []>} : vector<8x32xf32>, vector<32x96xf32>, vector<8x96xf32> -> vector<8x96xf32>
    %73 = vector.extract_strided_slice %71 {offsets = [0, 0], sizes = [8, 64], strides = [1, 1]} : vector<8x96xf32> to vector<8x64xf32>
    %74 = vector.extract_strided_slice %72 {offsets = [0, 0], sizes = [8, 64], strides = [1, 1]} : vector<8x96xf32> to vector<8x64xf32>
    %75 = arith.addf %73, %74 : vector<8x64xf32>
    %76 = arith.negf %75 : vector<8x64xf32>
    %77 = math.exp %76 : vector<8x64xf32>
    %cst_28 = arith.constant 1.000000e+00 : f32
    %78 = vector.broadcast %cst_28 : f32 to vector<8x64xf32>
    %79 = arith.addf %78, %77 : vector<8x64xf32>
    %80 = arith.divf %78, %79 : vector<8x64xf32>
    %81 = vector.extract_strided_slice %80 {offsets = [0, 0], sizes = [8, 32], strides = [1, 1]} : vector<8x64xf32> to vector<8x32xf32>
    %82 = vector.extract_strided_slice %80 {offsets = [0, 32], sizes = [8, 32], strides = [1, 1]} : vector<8x64xf32> to vector<8x32xf32>
    %83 = vector.extract_strided_slice %71 {offsets = [0, 64], sizes = [8, 32], strides = [1, 1]} : vector<8x96xf32> to vector<8x32xf32>
    %84 = vector.extract_strided_slice %72 {offsets = [0, 64], sizes = [8, 32], strides = [1, 1]} : vector<8x96xf32> to vector<8x32xf32>
    %85 = vector.broadcast %11 : vector<1x32xf32> to vector<8x32xf32>
    %86 = arith.addf %84, %85 : vector<8x32xf32>
    %87 = arith.mulf %81, %86 : vector<8x32xf32>
    %88 = arith.addf %83, %87 : vector<8x32xf32>
    %89 = math.tanh %88 : vector<8x32xf32>
    %90 = arith.subf %65, %89 : vector<8x32xf32>
    %91 = arith.mulf %82, %90 : vector<8x32xf32>
    %92 = arith.addf %89, %91 : vector<8x32xf32>
    %93 = arith.index_cast %69 : i32 to index
    %c0_29 = arith.constant 0 : index
    %94 = vector.load %arg14[%93, %c0_29] : memref<64x32xf32, #tpu.memory_space<vmem>>, vector<8x32xf32>
    tpu.vector_store %arg14[%93, %c0_29], %92 {strides = array<i32>} : memref<64x32xf32, #tpu.memory_space<vmem>>, vector<8x32xf32>,
    %c3_i32 = arith.constant 3 : i32
    %c8_i32_30 = arith.constant 8 : i32
    %95 = arith.muli %c3_i32, %c8_i32_30 : i32
    %96 = tpu.assume_multiple %95, 8 : i32
    %97 = arith.index_cast %96 : i32 to index
    %c0_31 = arith.constant 0 : index
    %98 = vector.load %arg16[%97, %c0_31] : memref<64x96xf32, #tpu.memory_space<vmem>>, vector<8x96xf32>
    %cst_32 = arith.constant dense<0.000000e+00> : vector<8x96xf32>
    %99 = tpu.matmul %92, %10, %cst_32 {dimension_numbers = #tpu.dot_dimension_numbers<[1], [0], [0], [1], [0, 0, 1, 1], [], []>} : vector<8x32xf32>, vector<32x96xf32>, vector<8x96xf32> -> vector<8x96xf32>
    %100 = vector.extract_strided_slice %98 {offsets = [0, 0], sizes = [8, 64], strides = [1, 1]} : vector<8x96xf32> to vector<8x64xf32>
    %101 = vector.extract_strided_slice %99 {offsets = [0, 0], sizes = [8, 64], strides = [1, 1]} : vector<8x96xf32> to vector<8x64xf32>
    %102 = arith.addf %100, %101 : vector<8x64xf32>
    %103 = arith.negf %102 : vector<8x64xf32>
    %104 = math.exp %103 : vector<8x64xf32>
    %cst_33 = arith.constant 1.000000e+00 : f32
    %105 = vector.broadcast %cst_33 : f32 to vector<8x64xf32>
    %106 = arith.addf %105, %104 : vector<8x64xf32>
    %107 = arith.divf %105, %106 : vector<8x64xf32>
    %108 = vector.extract_strided_slice %107 {offsets = [0, 0], sizes = [8, 32], strides = [1, 1]} : vector<8x64xf32> to vector<8x32xf32>
    %109 = vector.extract_strided_slice %107 {offsets = [0, 32], sizes = [8, 32], strides = [1, 1]} : vector<8x64xf32> to vector<8x32xf32>
    %110 = vector.extract_strided_slice %98 {offsets = [0, 64], sizes = [8, 32], strides = [1, 1]} : vector<8x96xf32> to vector<8x32xf32>
    %111 = vector.extract_strided_slice %99 {offsets = [0, 64], sizes = [8, 32], strides = [1, 1]} : vector<8x96xf32> to vector<8x32xf32>
    %112 = vector.broadcast %11 : vector<1x32xf32> to vector<8x32xf32>
    %113 = arith.addf %111, %112 : vector<8x32xf32>
    %114 = arith.mulf %108, %113 : vector<8x32xf32>
    %115 = arith.addf %110, %114 : vector<8x32xf32>
    %116 = math.tanh %115 : vector<8x32xf32>
    %117 = arith.subf %92, %116 : vector<8x32xf32>
    %118 = arith.mulf %109, %117 : vector<8x32xf32>
    %119 = arith.addf %116, %118 : vector<8x32xf32>
    %120 = arith.index_cast %96 : i32 to index
    %c0_34 = arith.constant 0 : index
    %121 = vector.load %arg14[%120, %c0_34] : memref<64x32xf32, #tpu.memory_space<vmem>>, vector<8x32xf32>
    tpu.vector_store %arg14[%120, %c0_34], %119 {strides = array<i32>} : memref<64x32xf32, #tpu.memory_space<vmem>>, vector<8x32xf32>,
    %c4_i32 = arith.constant 4 : i32
    %c8_i32_35 = arith.constant 8 : i32
    %122 = arith.muli %c4_i32, %c8_i32_35 : i32
    %123 = tpu.assume_multiple %122, 8 : i32
    %124 = arith.index_cast %123 : i32 to index
    %c0_36 = arith.constant 0 : index
    %125 = vector.load %arg16[%124, %c0_36] : memref<64x96xf32, #tpu.memory_space<vmem>>, vector<8x96xf32>
    %cst_37 = arith.constant dense<0.000000e+00> : vector<8x96xf32>
    %126 = tpu.matmul %119, %10, %cst_37 {dimension_numbers = #tpu.dot_dimension_numbers<[1], [0], [0], [1], [0, 0, 1, 1], [], []>} : vector<8x32xf32>, vector<32x96xf32>, vector<8x96xf32> -> vector<8x96xf32>
    %127 = vector.extract_strided_slice %125 {offsets = [0, 0], sizes = [8, 64], strides = [1, 1]} : vector<8x96xf32> to vector<8x64xf32>
    %128 = vector.extract_strided_slice %126 {offsets = [0, 0], sizes = [8, 64], strides = [1, 1]} : vector<8x96xf32> to vector<8x64xf32>
    %129 = arith.addf %127, %128 : vector<8x64xf32>
    %130 = arith.negf %129 : vector<8x64xf32>
    %131 = math.exp %130 : vector<8x64xf32>
    %cst_38 = arith.constant 1.000000e+00 : f32
    %132 = vector.broadcast %cst_38 : f32 to vector<8x64xf32>
    %133 = arith.addf %132, %131 : vector<8x64xf32>
    %134 = arith.divf %132, %133 : vector<8x64xf32>
    %135 = vector.extract_strided_slice %134 {offsets = [0, 0], sizes = [8, 32], strides = [1, 1]} : vector<8x64xf32> to vector<8x32xf32>
    %136 = vector.extract_strided_slice %134 {offsets = [0, 32], sizes = [8, 32], strides = [1, 1]} : vector<8x64xf32> to vector<8x32xf32>
    %137 = vector.extract_strided_slice %125 {offsets = [0, 64], sizes = [8, 32], strides = [1, 1]} : vector<8x96xf32> to vector<8x32xf32>
    %138 = vector.extract_strided_slice %126 {offsets = [0, 64], sizes = [8, 32], strides = [1, 1]} : vector<8x96xf32> to vector<8x32xf32>
    %139 = vector.broadcast %11 : vector<1x32xf32> to vector<8x32xf32>
    %140 = arith.addf %138, %139 : vector<8x32xf32>
    %141 = arith.mulf %135, %140 : vector<8x32xf32>
    %142 = arith.addf %137, %141 : vector<8x32xf32>
    %143 = math.tanh %142 : vector<8x32xf32>
    %144 = arith.subf %119, %143 : vector<8x32xf32>
    %145 = arith.mulf %136, %144 : vector<8x32xf32>
    %146 = arith.addf %143, %145 : vector<8x32xf32>
    %147 = arith.index_cast %123 : i32 to index
    %c0_39 = arith.constant 0 : index
    %148 = vector.load %arg14[%147, %c0_39] : memref<64x32xf32, #tpu.memory_space<vmem>>, vector<8x32xf32>
    tpu.vector_store %arg14[%147, %c0_39], %146 {strides = array<i32>} : memref<64x32xf32, #tpu.memory_space<vmem>>, vector<8x32xf32>,
    %c5_i32 = arith.constant 5 : i32
    %c8_i32_40 = arith.constant 8 : i32
    %149 = arith.muli %c5_i32, %c8_i32_40 : i32
    %150 = tpu.assume_multiple %149, 8 : i32
    %151 = arith.index_cast %150 : i32 to index
    %c0_41 = arith.constant 0 : index
    %152 = vector.load %arg16[%151, %c0_41] : memref<64x96xf32, #tpu.memory_space<vmem>>, vector<8x96xf32>
    %cst_42 = arith.constant dense<0.000000e+00> : vector<8x96xf32>
    %153 = tpu.matmul %146, %10, %cst_42 {dimension_numbers = #tpu.dot_dimension_numbers<[1], [0], [0], [1], [0, 0, 1, 1], [], []>} : vector<8x32xf32>, vector<32x96xf32>, vector<8x96xf32> -> vector<8x96xf32>
    %154 = vector.extract_strided_slice %152 {offsets = [0, 0], sizes = [8, 64], strides = [1, 1]} : vector<8x96xf32> to vector<8x64xf32>
    %155 = vector.extract_strided_slice %153 {offsets = [0, 0], sizes = [8, 64], strides = [1, 1]} : vector<8x96xf32> to vector<8x64xf32>
    %156 = arith.addf %154, %155 : vector<8x64xf32>
    %157 = arith.negf %156 : vector<8x64xf32>
    %158 = math.exp %157 : vector<8x64xf32>
    %cst_43 = arith.constant 1.000000e+00 : f32
    %159 = vector.broadcast %cst_43 : f32 to vector<8x64xf32>
    %160 = arith.addf %159, %158 : vector<8x64xf32>
    %161 = arith.divf %159, %160 : vector<8x64xf32>
    %162 = vector.extract_strided_slice %161 {offsets = [0, 0], sizes = [8, 32], strides = [1, 1]} : vector<8x64xf32> to vector<8x32xf32>
    %163 = vector.extract_strided_slice %161 {offsets = [0, 32], sizes = [8, 32], strides = [1, 1]} : vector<8x64xf32> to vector<8x32xf32>
    %164 = vector.extract_strided_slice %152 {offsets = [0, 64], sizes = [8, 32], strides = [1, 1]} : vector<8x96xf32> to vector<8x32xf32>
    %165 = vector.extract_strided_slice %153 {offsets = [0, 64], sizes = [8, 32], strides = [1, 1]} : vector<8x96xf32> to vector<8x32xf32>
    %166 = vector.broadcast %11 : vector<1x32xf32> to vector<8x32xf32>
    %167 = arith.addf %165, %166 : vector<8x32xf32>
    %168 = arith.mulf %162, %167 : vector<8x32xf32>
    %169 = arith.addf %164, %168 : vector<8x32xf32>
    %170 = math.tanh %169 : vector<8x32xf32>
    %171 = arith.subf %146, %170 : vector<8x32xf32>
    %172 = arith.mulf %163, %171 : vector<8x32xf32>
    %173 = arith.addf %170, %172 : vector<8x32xf32>
    %174 = arith.index_cast %150 : i32 to index
    %c0_44 = arith.constant 0 : index
    %175 = vector.load %arg14[%174, %c0_44] : memref<64x32xf32, #tpu.memory_space<vmem>>, vector<8x32xf32>
    tpu.vector_store %arg14[%174, %c0_44], %173 {strides = array<i32>} : memref<64x32xf32, #tpu.memory_space<vmem>>, vector<8x32xf32>,
    %c6_i32 = arith.constant 6 : i32
    %c8_i32_45 = arith.constant 8 : i32
    %176 = arith.muli %c6_i32, %c8_i32_45 : i32
    %177 = tpu.assume_multiple %176, 8 : i32
    %178 = arith.index_cast %177 : i32 to index
    %c0_46 = arith.constant 0 : index
    %179 = vector.load %arg16[%178, %c0_46] : memref<64x96xf32, #tpu.memory_space<vmem>>, vector<8x96xf32>
    %cst_47 = arith.constant dense<0.000000e+00> : vector<8x96xf32>
    %180 = tpu.matmul %173, %10, %cst_47 {dimension_numbers = #tpu.dot_dimension_numbers<[1], [0], [0], [1], [0, 0, 1, 1], [], []>} : vector<8x32xf32>, vector<32x96xf32>, vector<8x96xf32> -> vector<8x96xf32>
    %181 = vector.extract_strided_slice %179 {offsets = [0, 0], sizes = [8, 64], strides = [1, 1]} : vector<8x96xf32> to vector<8x64xf32>
    %182 = vector.extract_strided_slice %180 {offsets = [0, 0], sizes = [8, 64], strides = [1, 1]} : vector<8x96xf32> to vector<8x64xf32>
    %183 = arith.addf %181, %182 : vector<8x64xf32>
    %184 = arith.negf %183 : vector<8x64xf32>
    %185 = math.exp %184 : vector<8x64xf32>
    %cst_48 = arith.constant 1.000000e+00 : f32
    %186 = vector.broadcast %cst_48 : f32 to vector<8x64xf32>
    %187 = arith.addf %186, %185 : vector<8x64xf32>
    %188 = arith.divf %186, %187 : vector<8x64xf32>
    %189 = vector.extract_strided_slice %188 {offsets = [0, 0], sizes = [8, 32], strides = [1, 1]} : vector<8x64xf32> to vector<8x32xf32>
    %190 = vector.extract_strided_slice %188 {offsets = [0, 32], sizes = [8, 32], strides = [1, 1]} : vector<8x64xf32> to vector<8x32xf32>
    %191 = vector.extract_strided_slice %179 {offsets = [0, 64], sizes = [8, 32], strides = [1, 1]} : vector<8x96xf32> to vector<8x32xf32>
    %192 = vector.extract_strided_slice %180 {offsets = [0, 64], sizes = [8, 32], strides = [1, 1]} : vector<8x96xf32> to vector<8x32xf32>
    %193 = vector.broadcast %11 : vector<1x32xf32> to vector<8x32xf32>
    %194 = arith.addf %192, %193 : vector<8x32xf32>
    %195 = arith.mulf %189, %194 : vector<8x32xf32>
    %196 = arith.addf %191, %195 : vector<8x32xf32>
    %197 = math.tanh %196 : vector<8x32xf32>
    %198 = arith.subf %173, %197 : vector<8x32xf32>
    %199 = arith.mulf %190, %198 : vector<8x32xf32>
    %200 = arith.addf %197, %199 : vector<8x32xf32>
    %201 = arith.index_cast %177 : i32 to index
    %c0_49 = arith.constant 0 : index
    %202 = vector.load %arg14[%201, %c0_49] : memref<64x32xf32, #tpu.memory_space<vmem>>, vector<8x32xf32>
    tpu.vector_store %arg14[%201, %c0_49], %200 {strides = array<i32>} : memref<64x32xf32, #tpu.memory_space<vmem>>, vector<8x32xf32>,
    %c7_i32 = arith.constant 7 : i32
    %c8_i32_50 = arith.constant 8 : i32
    %203 = arith.muli %c7_i32, %c8_i32_50 : i32
    %204 = tpu.assume_multiple %203, 8 : i32
    %205 = arith.index_cast %204 : i32 to index
    %c0_51 = arith.constant 0 : index
    %206 = vector.load %arg16[%205, %c0_51] : memref<64x96xf32, #tpu.memory_space<vmem>>, vector<8x96xf32>
    %cst_52 = arith.constant dense<0.000000e+00> : vector<8x96xf32>
    %207 = tpu.matmul %200, %10, %cst_52 {dimension_numbers = #tpu.dot_dimension_numbers<[1], [0], [0], [1], [0, 0, 1, 1], [], []>} : vector<8x32xf32>, vector<32x96xf32>, vector<8x96xf32> -> vector<8x96xf32>
    %208 = vector.extract_strided_slice %206 {offsets = [0, 0], sizes = [8, 64], strides = [1, 1]} : vector<8x96xf32> to vector<8x64xf32>
    %209 = vector.extract_strided_slice %207 {offsets = [0, 0], sizes = [8, 64], strides = [1, 1]} : vector<8x96xf32> to vector<8x64xf32>
    %210 = arith.addf %208, %209 : vector<8x64xf32>
    %211 = arith.negf %210 : vector<8x64xf32>
    %212 = math.exp %211 : vector<8x64xf32>
    %cst_53 = arith.constant 1.000000e+00 : f32
    %213 = vector.broadcast %cst_53 : f32 to vector<8x64xf32>
    %214 = arith.addf %213, %212 : vector<8x64xf32>
    %215 = arith.divf %213, %214 : vector<8x64xf32>
    %216 = vector.extract_strided_slice %215 {offsets = [0, 0], sizes = [8, 32], strides = [1, 1]} : vector<8x64xf32> to vector<8x32xf32>
    %217 = vector.extract_strided_slice %215 {offsets = [0, 32], sizes = [8, 32], strides = [1, 1]} : vector<8x64xf32> to vector<8x32xf32>
    %218 = vector.extract_strided_slice %206 {offsets = [0, 64], sizes = [8, 32], strides = [1, 1]} : vector<8x96xf32> to vector<8x32xf32>
    %219 = vector.extract_strided_slice %207 {offsets = [0, 64], sizes = [8, 32], strides = [1, 1]} : vector<8x96xf32> to vector<8x32xf32>
    %220 = vector.broadcast %11 : vector<1x32xf32> to vector<8x32xf32>
    %221 = arith.addf %219, %220 : vector<8x32xf32>
    %222 = arith.mulf %216, %221 : vector<8x32xf32>
    %223 = arith.addf %218, %222 : vector<8x32xf32>
    %224 = math.tanh %223 : vector<8x32xf32>
    %225 = arith.subf %200, %224 : vector<8x32xf32>
    %226 = arith.mulf %217, %225 : vector<8x32xf32>
    %227 = arith.addf %224, %226 : vector<8x32xf32>
    %228 = arith.index_cast %204 : i32 to index
    %c0_54 = arith.constant 0 : index
    %229 = vector.load %arg14[%228, %c0_54] : memref<64x32xf32, #tpu.memory_space<vmem>>, vector<8x32xf32>
    tpu.vector_store %arg14[%228, %c0_54], %227 {strides = array<i32>} : memref<64x32xf32, #tpu.memory_space<vmem>>, vector<8x32xf32>,
    %c8_i32_55 = arith.constant 8 : i32
    %c0_56 = arith.constant 0 : index
    %c0_57 = arith.constant 0 : index
    %c0_58 = arith.constant 0 : index
    %230 = vector.load %arg13[%c0_56, %c0_57, %c0_58] : memref<2x8x32xf32, #tpu.memory_space<vmem>>, vector<1x8x32xf32>
    %231 = vector.shape_cast %230 : vector<1x8x32xf32> to vector<8x32xf32>
    %232 = vector.shape_cast %227 : vector<8x32xf32> to vector<1x8x32xf32>
    tpu.vector_store %arg13[%c0_56, %c0_57, %c0_58], %232 {strides = array<i32>} : memref<2x8x32xf32, #tpu.memory_space<vmem>>, vector<1x8x32xf32>,
    %c0_59 = arith.constant 0 : index
    %c0_60 = arith.constant 0 : index
    %233 = vector.load %arg14[%c0_59, %c0_60] : memref<64x32xf32, #tpu.memory_space<vmem>>, vector<64x32xf32>
    %c0_61 = arith.constant 0 : index
    %c0_62 = arith.constant 0 : index
    %234 = vector.load %arg6[%c0_61, %c0_62] : memref<32x96xf32, #tpu.memory_space<vmem>>, vector<32x96xf32>
    %cst_63 = arith.constant dense<0.000000e+00> : vector<64x96xf32>
    %235 = tpu.matmul %233, %234, %cst_63 {dimension_numbers = #tpu.dot_dimension_numbers<[1], [0], [0], [1], [0, 0, 1, 1], [], []>} : vector<64x32xf32>, vector<32x96xf32>, vector<64x96xf32> -> vector<64x96xf32>
    %c0_64 = arith.constant 0 : index
    %c0_65 = arith.constant 0 : index
    %236 = vector.load %arg8[%c0_64, %c0_65] : memref<1x96xf32, #tpu.memory_space<vmem>>, vector<1x96xf32>
    %237 = vector.broadcast %236 : vector<1x96xf32> to vector<64x96xf32>
    %238 = arith.addf %235, %237 : vector<64x96xf32>
    %c0_66 = arith.constant 0 : index
    %c0_67 = arith.constant 0 : index
    %239 = vector.load %arg16[%c0_66, %c0_67] : memref<64x96xf32, #tpu.memory_space<vmem>>, vector<64x96xf32>
    tpu.vector_store %arg16[%c0_66, %c0_67], %238 {strides = array<i32>} : memref<64x96xf32, #tpu.memory_space<vmem>>, vector<64x96xf32>,
    %c0_68 = arith.constant 0 : index
    %c0_69 = arith.constant 0 : index
    %240 = vector.load %arg7[%c0_68, %c0_69] : memref<32x96xf32, #tpu.memory_space<vmem>>, vector<32x96xf32>
    %c0_70 = arith.constant 0 : index
    %c0_71 = arith.constant 0 : index
    %241 = vector.load %arg9[%c0_70, %c0_71] : memref<1x32xf32, #tpu.memory_space<vmem>>, vector<1x32xf32>
    %c1 = arith.constant 1 : index
    %c0_72 = arith.constant 0 : index
    %c0_73 = arith.constant 0 : index
    %242 = vector.load %arg13[%c1, %c0_72, %c0_73] : memref<2x8x32xf32, #tpu.memory_space<vmem>>, vector<1x8x32xf32>
    %243 = vector.shape_cast %242 : vector<1x8x32xf32> to vector<8x32xf32>
    %c0_i32_74 = arith.constant 0 : i32
    %c8_i32_75 = arith.constant 8 : i32
    %244 = arith.muli %c0_i32_74, %c8_i32_75 : i32
    %245 = tpu.assume_multiple %244, 8 : i32
    %246 = arith.index_cast %245 : i32 to index
    %c0_76 = arith.constant 0 : index
    %247 = vector.load %arg16[%246, %c0_76] : memref<64x96xf32, #tpu.memory_space<vmem>>, vector<8x96xf32>
    %cst_77 = arith.constant dense<0.000000e+00> : vector<8x96xf32>
    %248 = tpu.matmul %243, %240, %cst_77 {dimension_numbers = #tpu.dot_dimension_numbers<[1], [0], [0], [1], [0, 0, 1, 1], [], []>} : vector<8x32xf32>, vector<32x96xf32>, vector<8x96xf32> -> vector<8x96xf32>
    %249 = vector.extract_strided_slice %247 {offsets = [0, 0], sizes = [8, 64], strides = [1, 1]} : vector<8x96xf32> to vector<8x64xf32>
    %250 = vector.extract_strided_slice %248 {offsets = [0, 0], sizes = [8, 64], strides = [1, 1]} : vector<8x96xf32> to vector<8x64xf32>
    %251 = arith.addf %249, %250 : vector<8x64xf32>
    %252 = arith.negf %251 : vector<8x64xf32>
    %253 = math.exp %252 : vector<8x64xf32>
    %cst_78 = arith.constant 1.000000e+00 : f32
    %254 = vector.broadcast %cst_78 : f32 to vector<8x64xf32>
    %255 = arith.addf %254, %253 : vector<8x64xf32>
    %256 = arith.divf %254, %255 : vector<8x64xf32>
    %257 = vector.extract_strided_slice %256 {offsets = [0, 0], sizes = [8, 32], strides = [1, 1]} : vector<8x64xf32> to vector<8x32xf32>
    %258 = vector.extract_strided_slice %256 {offsets = [0, 32], sizes = [8, 32], strides = [1, 1]} : vector<8x64xf32> to vector<8x32xf32>
    %259 = vector.extract_strided_slice %247 {offsets = [0, 64], sizes = [8, 32], strides = [1, 1]} : vector<8x96xf32> to vector<8x32xf32>
    %260 = vector.extract_strided_slice %248 {offsets = [0, 64], sizes = [8, 32], strides = [1, 1]} : vector<8x96xf32> to vector<8x32xf32>
    %261 = vector.broadcast %241 : vector<1x32xf32> to vector<8x32xf32>
    %262 = arith.addf %260, %261 : vector<8x32xf32>
    %263 = arith.mulf %257, %262 : vector<8x32xf32>
    %264 = arith.addf %259, %263 : vector<8x32xf32>
    %265 = math.tanh %264 : vector<8x32xf32>
    %266 = arith.subf %243, %265 : vector<8x32xf32>
    %267 = arith.mulf %258, %266 : vector<8x32xf32>
    %268 = arith.addf %265, %267 : vector<8x32xf32>
    %c1_i32_79 = arith.constant 1 : i32
    %c8_i32_80 = arith.constant 8 : i32
    %269 = arith.muli %c1_i32_79, %c8_i32_80 : i32
    %270 = tpu.assume_multiple %269, 8 : i32
    %271 = arith.index_cast %270 : i32 to index
    %c0_81 = arith.constant 0 : index
    %272 = vector.load %arg16[%271, %c0_81] : memref<64x96xf32, #tpu.memory_space<vmem>>, vector<8x96xf32>
    %cst_82 = arith.constant dense<0.000000e+00> : vector<8x96xf32>
    %273 = tpu.matmul %268, %240, %cst_82 {dimension_numbers = #tpu.dot_dimension_numbers<[1], [0], [0], [1], [0, 0, 1, 1], [], []>} : vector<8x32xf32>, vector<32x96xf32>, vector<8x96xf32> -> vector<8x96xf32>
    %274 = vector.extract_strided_slice %272 {offsets = [0, 0], sizes = [8, 64], strides = [1, 1]} : vector<8x96xf32> to vector<8x64xf32>
    %275 = vector.extract_strided_slice %273 {offsets = [0, 0], sizes = [8, 64], strides = [1, 1]} : vector<8x96xf32> to vector<8x64xf32>
    %276 = arith.addf %274, %275 : vector<8x64xf32>
    %277 = arith.negf %276 : vector<8x64xf32>
    %278 = math.exp %277 : vector<8x64xf32>
    %cst_83 = arith.constant 1.000000e+00 : f32
    %279 = vector.broadcast %cst_83 : f32 to vector<8x64xf32>
    %280 = arith.addf %279, %278 : vector<8x64xf32>
    %281 = arith.divf %279, %280 : vector<8x64xf32>
    %282 = vector.extract_strided_slice %281 {offsets = [0, 0], sizes = [8, 32], strides = [1, 1]} : vector<8x64xf32> to vector<8x32xf32>
    %283 = vector.extract_strided_slice %281 {offsets = [0, 32], sizes = [8, 32], strides = [1, 1]} : vector<8x64xf32> to vector<8x32xf32>
    %284 = vector.extract_strided_slice %272 {offsets = [0, 64], sizes = [8, 32], strides = [1, 1]} : vector<8x96xf32> to vector<8x32xf32>
    %285 = vector.extract_strided_slice %273 {offsets = [0, 64], sizes = [8, 32], strides = [1, 1]} : vector<8x96xf32> to vector<8x32xf32>
    %286 = vector.broadcast %241 : vector<1x32xf32> to vector<8x32xf32>
    %287 = arith.addf %285, %286 : vector<8x32xf32>
    %288 = arith.mulf %282, %287 : vector<8x32xf32>
    %289 = arith.addf %284, %288 : vector<8x32xf32>
    %290 = math.tanh %289 : vector<8x32xf32>
    %291 = arith.subf %268, %290 : vector<8x32xf32>
    %292 = arith.mulf %283, %291 : vector<8x32xf32>
    %293 = arith.addf %290, %292 : vector<8x32xf32>
    %c2_i32_84 = arith.constant 2 : i32
    %c8_i32_85 = arith.constant 8 : i32
    %294 = arith.muli %c2_i32_84, %c8_i32_85 : i32
    %295 = tpu.assume_multiple %294, 8 : i32
    %296 = arith.index_cast %295 : i32 to index
    %c0_86 = arith.constant 0 : index
    %297 = vector.load %arg16[%296, %c0_86] : memref<64x96xf32, #tpu.memory_space<vmem>>, vector<8x96xf32>
    %cst_87 = arith.constant dense<0.000000e+00> : vector<8x96xf32>
    %298 = tpu.matmul %293, %240, %cst_87 {dimension_numbers = #tpu.dot_dimension_numbers<[1], [0], [0], [1], [0, 0, 1, 1], [], []>} : vector<8x32xf32>, vector<32x96xf32>, vector<8x96xf32> -> vector<8x96xf32>
    %299 = vector.extract_strided_slice %297 {offsets = [0, 0], sizes = [8, 64], strides = [1, 1]} : vector<8x96xf32> to vector<8x64xf32>
    %300 = vector.extract_strided_slice %298 {offsets = [0, 0], sizes = [8, 64], strides = [1, 1]} : vector<8x96xf32> to vector<8x64xf32>
    %301 = arith.addf %299, %300 : vector<8x64xf32>
    %302 = arith.negf %301 : vector<8x64xf32>
    %303 = math.exp %302 : vector<8x64xf32>
    %cst_88 = arith.constant 1.000000e+00 : f32
    %304 = vector.broadcast %cst_88 : f32 to vector<8x64xf32>
    %305 = arith.addf %304, %303 : vector<8x64xf32>
    %306 = arith.divf %304, %305 : vector<8x64xf32>
    %307 = vector.extract_strided_slice %306 {offsets = [0, 0], sizes = [8, 32], strides = [1, 1]} : vector<8x64xf32> to vector<8x32xf32>
    %308 = vector.extract_strided_slice %306 {offsets = [0, 32], sizes = [8, 32], strides = [1, 1]} : vector<8x64xf32> to vector<8x32xf32>
    %309 = vector.extract_strided_slice %297 {offsets = [0, 64], sizes = [8, 32], strides = [1, 1]} : vector<8x96xf32> to vector<8x32xf32>
    %310 = vector.extract_strided_slice %298 {offsets = [0, 64], sizes = [8, 32], strides = [1, 1]} : vector<8x96xf32> to vector<8x32xf32>
    %311 = vector.broadcast %241 : vector<1x32xf32> to vector<8x32xf32>
    %312 = arith.addf %310, %311 : vector<8x32xf32>
    %313 = arith.mulf %307, %312 : vector<8x32xf32>
    %314 = arith.addf %309, %313 : vector<8x32xf32>
    %315 = math.tanh %314 : vector<8x32xf32>
    %316 = arith.subf %293, %315 : vector<8x32xf32>
    %317 = arith.mulf %308, %316 : vector<8x32xf32>
    %318 = arith.addf %315, %317 : vector<8x32xf32>
    %c3_i32_89 = arith.constant 3 : i32
    %c8_i32_90 = arith.constant 8 : i32
    %319 = arith.muli %c3_i32_89, %c8_i32_90 : i32
    %320 = tpu.assume_multiple %319, 8 : i32
    %321 = arith.index_cast %320 : i32 to index
    %c0_91 = arith.constant 0 : index
    %322 = vector.load %arg16[%321, %c0_91] : memref<64x96xf32, #tpu.memory_space<vmem>>, vector<8x96xf32>
    %cst_92 = arith.constant dense<0.000000e+00> : vector<8x96xf32>
    %323 = tpu.matmul %318, %240, %cst_92 {dimension_numbers = #tpu.dot_dimension_numbers<[1], [0], [0], [1], [0, 0, 1, 1], [], []>} : vector<8x32xf32>, vector<32x96xf32>, vector<8x96xf32> -> vector<8x96xf32>
    %324 = vector.extract_strided_slice %322 {offsets = [0, 0], sizes = [8, 64], strides = [1, 1]} : vector<8x96xf32> to vector<8x64xf32>
    %325 = vector.extract_strided_slice %323 {offsets = [0, 0], sizes = [8, 64], strides = [1, 1]} : vector<8x96xf32> to vector<8x64xf32>
    %326 = arith.addf %324, %325 : vector<8x64xf32>
    %327 = arith.negf %326 : vector<8x64xf32>
    %328 = math.exp %327 : vector<8x64xf32>
    %cst_93 = arith.constant 1.000000e+00 : f32
    %329 = vector.broadcast %cst_93 : f32 to vector<8x64xf32>
    %330 = arith.addf %329, %328 : vector<8x64xf32>
    %331 = arith.divf %329, %330 : vector<8x64xf32>
    %332 = vector.extract_strided_slice %331 {offsets = [0, 0], sizes = [8, 32], strides = [1, 1]} : vector<8x64xf32> to vector<8x32xf32>
    %333 = vector.extract_strided_slice %331 {offsets = [0, 32], sizes = [8, 32], strides = [1, 1]} : vector<8x64xf32> to vector<8x32xf32>
    %334 = vector.extract_strided_slice %322 {offsets = [0, 64], sizes = [8, 32], strides = [1, 1]} : vector<8x96xf32> to vector<8x32xf32>
    %335 = vector.extract_strided_slice %323 {offsets = [0, 64], sizes = [8, 32], strides = [1, 1]} : vector<8x96xf32> to vector<8x32xf32>
    %336 = vector.broadcast %241 : vector<1x32xf32> to vector<8x32xf32>
    %337 = arith.addf %335, %336 : vector<8x32xf32>
    %338 = arith.mulf %332, %337 : vector<8x32xf32>
    %339 = arith.addf %334, %338 : vector<8x32xf32>
    %340 = math.tanh %339 : vector<8x32xf32>
    %341 = arith.subf %318, %340 : vector<8x32xf32>
    %342 = arith.mulf %333, %341 : vector<8x32xf32>
    %343 = arith.addf %340, %342 : vector<8x32xf32>
    %c4_i32_94 = arith.constant 4 : i32
    %c8_i32_95 = arith.constant 8 : i32
    %344 = arith.muli %c4_i32_94, %c8_i32_95 : i32
    %345 = tpu.assume_multiple %344, 8 : i32
    %346 = arith.index_cast %345 : i32 to index
    %c0_96 = arith.constant 0 : index
    %347 = vector.load %arg16[%346, %c0_96] : memref<64x96xf32, #tpu.memory_space<vmem>>, vector<8x96xf32>
    %cst_97 = arith.constant dense<0.000000e+00> : vector<8x96xf32>
    %348 = tpu.matmul %343, %240, %cst_97 {dimension_numbers = #tpu.dot_dimension_numbers<[1], [0], [0], [1], [0, 0, 1, 1], [], []>} : vector<8x32xf32>, vector<32x96xf32>, vector<8x96xf32> -> vector<8x96xf32>
    %349 = vector.extract_strided_slice %347 {offsets = [0, 0], sizes = [8, 64], strides = [1, 1]} : vector<8x96xf32> to vector<8x64xf32>
    %350 = vector.extract_strided_slice %348 {offsets = [0, 0], sizes = [8, 64], strides = [1, 1]} : vector<8x96xf32> to vector<8x64xf32>
    %351 = arith.addf %349, %350 : vector<8x64xf32>
    %352 = arith.negf %351 : vector<8x64xf32>
    %353 = math.exp %352 : vector<8x64xf32>
    %cst_98 = arith.constant 1.000000e+00 : f32
    %354 = vector.broadcast %cst_98 : f32 to vector<8x64xf32>
    %355 = arith.addf %354, %353 : vector<8x64xf32>
    %356 = arith.divf %354, %355 : vector<8x64xf32>
    %357 = vector.extract_strided_slice %356 {offsets = [0, 0], sizes = [8, 32], strides = [1, 1]} : vector<8x64xf32> to vector<8x32xf32>
    %358 = vector.extract_strided_slice %356 {offsets = [0, 32], sizes = [8, 32], strides = [1, 1]} : vector<8x64xf32> to vector<8x32xf32>
    %359 = vector.extract_strided_slice %347 {offsets = [0, 64], sizes = [8, 32], strides = [1, 1]} : vector<8x96xf32> to vector<8x32xf32>
    %360 = vector.extract_strided_slice %348 {offsets = [0, 64], sizes = [8, 32], strides = [1, 1]} : vector<8x96xf32> to vector<8x32xf32>
    %361 = vector.broadcast %241 : vector<1x32xf32> to vector<8x32xf32>
    %362 = arith.addf %360, %361 : vector<8x32xf32>
    %363 = arith.mulf %357, %362 : vector<8x32xf32>
    %364 = arith.addf %359, %363 : vector<8x32xf32>
    %365 = math.tanh %364 : vector<8x32xf32>
    %366 = arith.subf %343, %365 : vector<8x32xf32>
    %367 = arith.mulf %358, %366 : vector<8x32xf32>
    %368 = arith.addf %365, %367 : vector<8x32xf32>
    %c5_i32_99 = arith.constant 5 : i32
    %c8_i32_100 = arith.constant 8 : i32
    %369 = arith.muli %c5_i32_99, %c8_i32_100 : i32
    %370 = tpu.assume_multiple %369, 8 : i32
    %371 = arith.index_cast %370 : i32 to index
    %c0_101 = arith.constant 0 : index
    %372 = vector.load %arg16[%371, %c0_101] : memref<64x96xf32, #tpu.memory_space<vmem>>, vector<8x96xf32>
    %cst_102 = arith.constant dense<0.000000e+00> : vector<8x96xf32>
    %373 = tpu.matmul %368, %240, %cst_102 {dimension_numbers = #tpu.dot_dimension_numbers<[1], [0], [0], [1], [0, 0, 1, 1], [], []>} : vector<8x32xf32>, vector<32x96xf32>, vector<8x96xf32> -> vector<8x96xf32>
    %374 = vector.extract_strided_slice %372 {offsets = [0, 0], sizes = [8, 64], strides = [1, 1]} : vector<8x96xf32> to vector<8x64xf32>
    %375 = vector.extract_strided_slice %373 {offsets = [0, 0], sizes = [8, 64], strides = [1, 1]} : vector<8x96xf32> to vector<8x64xf32>
    %376 = arith.addf %374, %375 : vector<8x64xf32>
    %377 = arith.negf %376 : vector<8x64xf32>
    %378 = math.exp %377 : vector<8x64xf32>
    %cst_103 = arith.constant 1.000000e+00 : f32
    %379 = vector.broadcast %cst_103 : f32 to vector<8x64xf32>
    %380 = arith.addf %379, %378 : vector<8x64xf32>
    %381 = arith.divf %379, %380 : vector<8x64xf32>
    %382 = vector.extract_strided_slice %381 {offsets = [0, 0], sizes = [8, 32], strides = [1, 1]} : vector<8x64xf32> to vector<8x32xf32>
    %383 = vector.extract_strided_slice %381 {offsets = [0, 32], sizes = [8, 32], strides = [1, 1]} : vector<8x64xf32> to vector<8x32xf32>
    %384 = vector.extract_strided_slice %372 {offsets = [0, 64], sizes = [8, 32], strides = [1, 1]} : vector<8x96xf32> to vector<8x32xf32>
    %385 = vector.extract_strided_slice %373 {offsets = [0, 64], sizes = [8, 32], strides = [1, 1]} : vector<8x96xf32> to vector<8x32xf32>
    %386 = vector.broadcast %241 : vector<1x32xf32> to vector<8x32xf32>
    %387 = arith.addf %385, %386 : vector<8x32xf32>
    %388 = arith.mulf %382, %387 : vector<8x32xf32>
    %389 = arith.addf %384, %388 : vector<8x32xf32>
    %390 = math.tanh %389 : vector<8x32xf32>
    %391 = arith.subf %368, %390 : vector<8x32xf32>
    %392 = arith.mulf %383, %391 : vector<8x32xf32>
    %393 = arith.addf %390, %392 : vector<8x32xf32>
    %c6_i32_104 = arith.constant 6 : i32
    %c8_i32_105 = arith.constant 8 : i32
    %394 = arith.muli %c6_i32_104, %c8_i32_105 : i32
    %395 = tpu.assume_multiple %394, 8 : i32
    %396 = arith.index_cast %395 : i32 to index
    %c0_106 = arith.constant 0 : index
    %397 = vector.load %arg16[%396, %c0_106] : memref<64x96xf32, #tpu.memory_space<vmem>>, vector<8x96xf32>
    %cst_107 = arith.constant dense<0.000000e+00> : vector<8x96xf32>
    %398 = tpu.matmul %393, %240, %cst_107 {dimension_numbers = #tpu.dot_dimension_numbers<[1], [0], [0], [1], [0, 0, 1, 1], [], []>} : vector<8x32xf32>, vector<32x96xf32>, vector<8x96xf32> -> vector<8x96xf32>
    %399 = vector.extract_strided_slice %397 {offsets = [0, 0], sizes = [8, 64], strides = [1, 1]} : vector<8x96xf32> to vector<8x64xf32>
    %400 = vector.extract_strided_slice %398 {offsets = [0, 0], sizes = [8, 64], strides = [1, 1]} : vector<8x96xf32> to vector<8x64xf32>
    %401 = arith.addf %399, %400 : vector<8x64xf32>
    %402 = arith.negf %401 : vector<8x64xf32>
    %403 = math.exp %402 : vector<8x64xf32>
    %cst_108 = arith.constant 1.000000e+00 : f32
    %404 = vector.broadcast %cst_108 : f32 to vector<8x64xf32>
    %405 = arith.addf %404, %403 : vector<8x64xf32>
    %406 = arith.divf %404, %405 : vector<8x64xf32>
    %407 = vector.extract_strided_slice %406 {offsets = [0, 0], sizes = [8, 32], strides = [1, 1]} : vector<8x64xf32> to vector<8x32xf32>
    %408 = vector.extract_strided_slice %406 {offsets = [0, 32], sizes = [8, 32], strides = [1, 1]} : vector<8x64xf32> to vector<8x32xf32>
    %409 = vector.extract_strided_slice %397 {offsets = [0, 64], sizes = [8, 32], strides = [1, 1]} : vector<8x96xf32> to vector<8x32xf32>
    %410 = vector.extract_strided_slice %398 {offsets = [0, 64], sizes = [8, 32], strides = [1, 1]} : vector<8x96xf32> to vector<8x32xf32>
    %411 = vector.broadcast %241 : vector<1x32xf32> to vector<8x32xf32>
    %412 = arith.addf %410, %411 : vector<8x32xf32>
    %413 = arith.mulf %407, %412 : vector<8x32xf32>
    %414 = arith.addf %409, %413 : vector<8x32xf32>
    %415 = math.tanh %414 : vector<8x32xf32>
    %416 = arith.subf %393, %415 : vector<8x32xf32>
    %417 = arith.mulf %408, %416 : vector<8x32xf32>
    %418 = arith.addf %415, %417 : vector<8x32xf32>
    %c7_i32_109 = arith.constant 7 : i32
    %c8_i32_110 = arith.constant 8 : i32
    %419 = arith.muli %c7_i32_109, %c8_i32_110 : i32
    %420 = tpu.assume_multiple %419, 8 : i32
    %421 = arith.index_cast %420 : i32 to index
    %c0_111 = arith.constant 0 : index
    %422 = vector.load %arg16[%421, %c0_111] : memref<64x96xf32, #tpu.memory_space<vmem>>, vector<8x96xf32>
    %cst_112 = arith.constant dense<0.000000e+00> : vector<8x96xf32>
    %423 = tpu.matmul %418, %240, %cst_112 {dimension_numbers = #tpu.dot_dimension_numbers<[1], [0], [0], [1], [0, 0, 1, 1], [], []>} : vector<8x32xf32>, vector<32x96xf32>, vector<8x96xf32> -> vector<8x96xf32>
    %424 = vector.extract_strided_slice %422 {offsets = [0, 0], sizes = [8, 64], strides = [1, 1]} : vector<8x96xf32> to vector<8x64xf32>
    %425 = vector.extract_strided_slice %423 {offsets = [0, 0], sizes = [8, 64], strides = [1, 1]} : vector<8x96xf32> to vector<8x64xf32>
    %426 = arith.addf %424, %425 : vector<8x64xf32>
    %427 = arith.negf %426 : vector<8x64xf32>
    %428 = math.exp %427 : vector<8x64xf32>
    %cst_113 = arith.constant 1.000000e+00 : f32
    %429 = vector.broadcast %cst_113 : f32 to vector<8x64xf32>
    %430 = arith.addf %429, %428 : vector<8x64xf32>
    %431 = arith.divf %429, %430 : vector<8x64xf32>
    %432 = vector.extract_strided_slice %431 {offsets = [0, 0], sizes = [8, 32], strides = [1, 1]} : vector<8x64xf32> to vector<8x32xf32>
    %433 = vector.extract_strided_slice %431 {offsets = [0, 32], sizes = [8, 32], strides = [1, 1]} : vector<8x64xf32> to vector<8x32xf32>
    %434 = vector.extract_strided_slice %422 {offsets = [0, 64], sizes = [8, 32], strides = [1, 1]} : vector<8x96xf32> to vector<8x32xf32>
    %435 = vector.extract_strided_slice %423 {offsets = [0, 64], sizes = [8, 32], strides = [1, 1]} : vector<8x96xf32> to vector<8x32xf32>
    %436 = vector.broadcast %241 : vector<1x32xf32> to vector<8x32xf32>
    %437 = arith.addf %435, %436 : vector<8x32xf32>
    %438 = arith.mulf %432, %437 : vector<8x32xf32>
    %439 = arith.addf %434, %438 : vector<8x32xf32>
    %440 = math.tanh %439 : vector<8x32xf32>
    %441 = arith.subf %418, %440 : vector<8x32xf32>
    %442 = arith.mulf %433, %441 : vector<8x32xf32>
    %443 = arith.addf %440, %442 : vector<8x32xf32>
    %c8_i32_114 = arith.constant 8 : i32
    %c1_115 = arith.constant 1 : index
    %c0_116 = arith.constant 0 : index
    %c0_117 = arith.constant 0 : index
    %444 = vector.load %arg13[%c1_115, %c0_116, %c0_117] : memref<2x8x32xf32, #tpu.memory_space<vmem>>, vector<1x8x32xf32>
    %445 = vector.shape_cast %444 : vector<1x8x32xf32> to vector<8x32xf32>
    %446 = vector.shape_cast %443 : vector<8x32xf32> to vector<1x8x32xf32>
    tpu.vector_store %arg13[%c1_115, %c0_116, %c0_117], %446 {strides = array<i32>} : memref<2x8x32xf32, #tpu.memory_space<vmem>>, vector<1x8x32xf32>,
    %c0_i32_118 = arith.constant 0 : i32
    %447 = arith.cmpi eq, %arg0, %c0_i32_118 : i32
    %448 = arith.extui %447 : i1 to i32
    %c0_i32_119 = arith.constant 0 : i32
    %449 = arith.cmpi ne, %448, %c0_i32_119 : i32
    scf.if %449 {
      %c1_120 = arith.constant 1 : index
      %c0_121 = arith.constant 0 : index
      %c0_122 = arith.constant 0 : index
      %450 = vector.load %arg13[%c1_120, %c0_121, %c0_122] : memref<2x8x32xf32, #tpu.memory_space<vmem>>, vector<1x8x32xf32>
      %451 = vector.shape_cast %450 : vector<1x8x32xf32> to vector<8x32xf32>
      %c0_123 = arith.constant 0 : index
      %c0_124 = arith.constant 0 : index
      %452 = vector.load %arg10[%c0_123, %c0_124] : memref<32x8xf32, #tpu.memory_space<vmem>>, vector<32x8xf32>
      %cst_125 = arith.constant dense<0.000000e+00> : vector<8x8xf32>
      %453 = tpu.matmul %451, %452, %cst_125 {dimension_numbers = #tpu.dot_dimension_numbers<[1], [0], [0], [1], [0, 0, 1, 1], [], []>} : vector<8x32xf32>, vector<32x8xf32>, vector<8x8xf32> -> vector<8x8xf32>
      %c0_126 = arith.constant 0 : index
      %c0_127 = arith.constant 0 : index
      %454 = vector.load %arg11[%c0_126, %c0_127] : memref<1x8xf32, #tpu.memory_space<vmem>>, vector<1x8xf32>
      %455 = vector.broadcast %454 : vector<1x8xf32> to vector<8x8xf32>
      %456 = arith.addf %453, %455 : vector<8x8xf32>
      %c0_128 = arith.constant 0 : index
      %c0_129 = arith.constant 0 : index
      %457 = vector.load %arg12[%c0_128, %c0_129] : memref<8x8xf32, #tpu.memory_space<vmem>>, vector<8x8xf32>
      tpu.vector_store %arg12[%c0_128, %c0_129], %456 {strides = array<i32>} : memref<8x8xf32, #tpu.memory_space<vmem>>, vector<8x8xf32>,
    } else {
    }
    return
  }
  func.func @transform_0(%arg0: i32) -> (i32, i32) {
    %c0_i32 = arith.constant 0 : i32
    %c0_i32_0 = arith.constant 0 : i32
    return %arg0, %c0_i32 : i32, i32
  }
  func.func @transform_1(%arg0: i32) -> (i32, i32) {
    %c0_i32 = arith.constant 0 : i32
    %c0_i32_0 = arith.constant 0 : i32
    %c0_i32_1 = arith.constant 0 : i32
    return %c0_i32, %c0_i32_0 : i32, i32
  }
  func.func @transform_2(%arg0: i32) -> (i32, i32) {
    %c0_i32 = arith.constant 0 : i32
    %c0_i32_0 = arith.constant 0 : i32
    %c0_i32_1 = arith.constant 0 : i32
    return %c0_i32, %c0_i32_0 : i32, i32
  }
  func.func @transform_3(%arg0: i32) -> (i32, i32) {
    %c0_i32 = arith.constant 0 : i32
    %c0_i32_0 = arith.constant 0 : i32
    %c0_i32_1 = arith.constant 0 : i32
    return %c0_i32, %c0_i32_0 : i32, i32
  }
  func.func @transform_4(%arg0: i32) -> (i32, i32) {
    %c0_i32 = arith.constant 0 : i32
    %c0_i32_0 = arith.constant 0 : i32
    %c0_i32_1 = arith.constant 0 : i32
    return %c0_i32, %c0_i32_0 : i32, i32
  }
  func.func @transform_5(%arg0: i32) -> (i32, i32) {
    %c0_i32 = arith.constant 0 : i32
    %c0_i32_0 = arith.constant 0 : i32
    %c0_i32_1 = arith.constant 0 : i32
    return %c0_i32, %c0_i32_0 : i32, i32
  }
  func.func @transform_6(%arg0: i32) -> (i32, i32) {
    %c0_i32 = arith.constant 0 : i32
    %c0_i32_0 = arith.constant 0 : i32
    %c0_i32_1 = arith.constant 0 : i32
    return %c0_i32, %c0_i32_0 : i32, i32
  }
  func.func @transform_7(%arg0: i32) -> (i32, i32) {
    %c0_i32 = arith.constant 0 : i32
    %c0_i32_0 = arith.constant 0 : i32
    %c0_i32_1 = arith.constant 0 : i32
    return %c0_i32, %c0_i32_0 : i32, i32
  }
  func.func @transform_8(%arg0: i32) -> (i32, i32) {
    %c0_i32 = arith.constant 0 : i32
    %c0_i32_0 = arith.constant 0 : i32
    %c0_i32_1 = arith.constant 0 : i32
    return %c0_i32, %c0_i32_0 : i32, i32
  }
  func.func @transform_9(%arg0: i32) -> (i32, i32) {
    %c0_i32 = arith.constant 0 : i32
    %c0_i32_0 = arith.constant 0 : i32
    %c0_i32_1 = arith.constant 0 : i32
    return %c0_i32, %c0_i32_0 : i32, i32
  }
  func.func @transform_10(%arg0: i32) -> (i32, i32) {
    %c0_i32 = arith.constant 0 : i32
    %c0_i32_0 = arith.constant 0 : i32
    %c0_i32_1 = arith.constant 0 : i32
    return %c0_i32, %c0_i32_0 : i32, i32
  }
  func.func @transform_11(%arg0: i32) -> (i32, i32) {
    %c0_i32 = arith.constant 0 : i32
    %c0_i32_0 = arith.constant 0 : i32
    %c0_i32_1 = arith.constant 0 : i32
    return %c0_i32, %c0_i32_0 : i32, i32
  }
}

</mosaic_0001>

<bundles_post_ra>
// kernel: gru_model_forward.1
= control target key start
LH: loop header
LB: loop body
LE: loop exit
PB: predicated region body
PF: predicated region fallthrough
CT: control target
= control target key end

     0   :  { %vm42_vm0 = vcmask 261120   ;;  %v2705_v0 = vmov 0.0   ;;  %vm2706_vm1 = vmmov 0   ;;  %vm62_vm2 = vcmask 130048   ;;  %s2707_s15 = smov 64   ;;  %s2709_s16 = smov 96   ;;  %s3243_s1 = inlined_call_operand.vmem [shape: f32[16,96], index: 1, kind: input, shape index: {}]   ;;  %s3244_s2 = inlined_call_operand.vmem [shape: f32[32,96], index: 2, kind: input, shape index: {}]   ;;  %s3245_s0 = inlined_call_operand.vmem [shape: f32[64,16], index: 0, kind: input, shape index: {}]   ;;  %s3246_s4 = inlined_call_operand.vmem [shape: f32[1,32], index: 4, kind: input, shape index: {}]   ;;  %s3247_s3 = inlined_call_operand.vmem [shape: f32[1,96], index: 3, kind: input, shape index: {}]   ;;  %s3248_s5 = inlined_call_operand.vmem [shape: f32[32,96], index: 5, kind: input, shape index: {}]   ;;  %s3249_s7 = inlined_call_operand.vmem [shape: f32[1,96], index: 7, kind: input, shape index: {}]   ;;  %s3250_s6 = inlined_call_operand.vmem [shape: f32[32,96], index: 6, kind: input, shape index: {}]   ;;  %s3251_s8 = inlined_call_operand.vmem [shape: f32[1,32], index: 8, kind: input, shape index: {}]   ;;  %s3252_s9 = inlined_call_operand.vmem [shape: f32[32,8], index: 9, kind: input, shape index: {}]   ;;  %s3253_s10 = inlined_call_operand.vmem [shape: f32[1,8], index: 10, kind: input, shape index: {}]   ;;  %s3254_s11 = inlined_call_operand.vmem [shape: f32[8,8], index: 11, kind: output, shape index: {}]  }
   0x1   :  { %2397 = vmatprep.subr.mxu1 %v2705_v0  ;;  %v54_v1 = vld [vmem:[%s3243_s1 + $0x8] sm:$0xff]  ;;  %v2777_v2 = vld [vmem:[%s3244_s2 + $0x18] sm:$0xff]  ;;  %v53_v3 = vld [vmem:[%s3243_s1] sm:$0xff]  ;;  %2405 = vmatprep.mubr.msk.f32.mxu1 %vm2706_vm1, %v2705_v0  ;;  %43 = vst.msk [vmem:[#allocation2] sm:$0xff] %vm42_vm0, %v2705_v0  ;;  %vm192_vm3 = vcmask 785408   ;;  %vm2214_vm4 = vcmask 64512  }
   0x2   :  { %44 = vst.msk [vmem:[#allocation2 + $0x8] sm:$0xff] %vm42_vm0, %v2705_v0  ;;  %2381 = vmatprep.subr.mxu0 %v54_v1  ;;  %2398 = vmatpush3.msra.mxu1 %v2777_v2  ;;  %v2792_v4 = vld [vmem:[%s3244_s2 + $0x10] sm:$0xff]  ;;  %v45_v5 = vld [vmem:[%s3245_s0] sm:$0xff]  ;;  %v46_v6 = vld [vmem:[%s3245_s0 + $0x8] sm:$0xff] }
   0x3   :  { %2382 = vmatpush3.msra.mxu0 %v54_v1  ;;  %2399 = vmatprep.subr.mxu1 %v2705_v0  ;;  %v2805_v7 = vld [vmem:[%s3244_s2 + $0x8] sm:$0xff]  ;;  %v2231_v8 = vld [vmem:[%s3246_s4] ss:$0 sm:$0xff]  ;;  %v47_v53 = vld [vmem:[%s3245_s0 + $0x10] sm:$0xff] }
   0x4   :  { %2383 = vmatprep.subr.mxu0 %v53_v3  ;;  %2400 = vmatpush3.msra.mxu1 %v2792_v4  ;;  %v2816_v9 = vld [vmem:[%s3244_s2] sm:$0xff]  ;;  %v48_v54 = vld [vmem:[%s3245_s0 + $0x18] sm:$0xff]  ;;  %v50_v56 = vld [vmem:[%s3245_s0 + $0x28] sm:$0xff] }
   0x5   :  { %2384 = vmatpush3.msra.mxu0 %v53_v3  ;;  %2385 = vmatprep.mubr.msk.f32.mxu0 %vm62_vm2, %v45_v5  ;;  %v2846_v12 = vld [vmem:[%s3247_s3] ss:$0 sm:$0xff]  ;;  %s2708_s3 = smov 32   ;;  %v51_v57 = vld [vmem:[%s3245_s0 + $0x30] sm:$0xff]  ;;  %v52_v58 = vld [vmem:[%s3245_s0 + $0x38] sm:$0xff] }
   0x6   :  { %2401 = vmatprep.subr.mxu1 %v2705_v0  ;;  %2386 = vmatmul.mubr.msk.f32.vlgmr.msra.gmra.mxu0 %vm62_vm2, %v46_v6  ;;  %v49_v55 = vld [vmem:[%s3245_s0 + $0x20] sm:$0xff] }
   0x7   :  { %2402 = vmatpush3.msra.mxu1 %v2805_v7  ;;  %294 = vrot.lane.b32.xlu0 %v2231_v8, %s2707_s15 }
   0x8   :  { %2403 = vmatprep.subr.mxu1 %v2705_v0  ;;  %v206_v10 = vld [vmem:[#allocation2] sm:$0xff]  ;;  %2419 = vmatprep.subr.mxu0 %v2705_v0 }
   0x9   :  { %2404 = vmatpush3.msra.mxu1 %v2816_v9  ;;  %2420 = vmatpush3.msra.mxu0 %v2777_v2 }
   0xa   :  { %2406 = vmatmul.mubr.msk.f32.vlgmr.msra.gmra.mxu1 %vm42_vm0, %v206_v10  ;;  %2408 = vmatprep.subr.mxu1 %v2705_v0 }
   0xb   :  { %2409 = vmatpush3.msra.mxu1 %v2777_v2  ;;  %2416 = vmatprep.mubr.msk.f32.mxu1 %vm2706_vm1, %v2705_v0 }
   0xc   :  { %2410 = vmatprep.subr.mxu1 %v2705_v0  ;;  %2421 = vmatprep.subr.mxu0 %v2705_v0 }
   0xd   :  { %2411 = vmatpush3.msra.mxu1 %v2792_v4  ;;  %2422 = vmatpush3.msra.mxu0 %v2792_v4 }
   0xe   :  { %2412 = vmatprep.subr.mxu1 %v2705_v0  ;;  %2423 = vmatprep.subr.mxu0 %v2705_v0 }
   0xf   :  { %2413 = vmatpush3.msra.mxu1 %v2805_v7  ;;  %2424 = vmatpush3.msra.mxu0 %v2805_v7 }
  0x10   :  { %2414 = vmatprep.subr.mxu1 %v2705_v0  ;;  %2425 = vmatprep.subr.mxu0 %v2705_v0 }
  0x11   :  { %2415 = vmatpush3.msra.mxu1 %v2816_v9  ;;  %2426 = vmatpush3.msra.mxu0 %v2816_v9 }
  0x12   :  { %2430 = vmatprep.subr.mxu1 %v2705_v0  ;;  %2441 = vmatprep.subr.mxu0 %v2705_v0 }
  0x13   :  { %2388 = vmatprep.mubr.msk.f32.mxu0 %vm62_vm2, %v47_v53 }
  0x14   :  { %2389 = vmatmul.mubr.msk.f32.gmra.mxu0 %vm62_vm2, %v48_v54 }
  0x15   :  { %2391 = vmatprep.mubr.msk.f32.mxu0 %vm62_vm2, %v49_v55 }
  0x18   :  { %2392 = vmatmul.mubr.msk.f32.gmra.mxu0 %vm62_vm2, %v50_v56 }
  0x19   :  { %2394 = vmatprep.mubr.msk.f32.mxu0 %vm62_vm2, %v51_v57 }
  0x1c   :  { %2395 = vmatmul.mubr.msk.f32.gmra.mxu0 %vm62_vm2, %v52_v58 }
  0x1d   :  { %2427 = vmatprep.mubr.msk.f32.mxu0 %vm2706_vm1, %v2705_v0 }
  0x79   :  { %v2849_v15 = vpop.permute.xlu0 %294 }
  0xc6   :  { %v2387_v11 = vpop.f32.mrf.mxu0 }
  0xc7   :  { %v159_v13 = vadd.f32 %v2387_v11, %v2846_v12 }
  0xc8   :  { %v153_v14 = vpop.f32.mrf.mxu0 }
  0xc9   :  { %194 = vst.msk [vmem:[#allocation5 + $0x8] sm:$0xff] %vm192_vm3, %v159_v13  ;;  %v154_v16 = vadd.f32 %v2846_v12, %v153_v14 }
  0xca   :  { %v278_v17 = vpop.f32.mrf.mxu1 }
  0xcb   :  { %193 = vst.msk [vmem:[#allocation5] sm:$0xff] %vm192_vm3, %v154_v16  ;;  %v297_v18 = vadd.f32 %v2849_v15, %v278_v17 }
  0xcc   :  { %v2407_v19 = vpop.f32.mrf.mxu1 }
  0xcd   :  { %299 = vrot.lane.b32.xlu0 %v297_v18, %s2707_s15 }
  0xd0   :  { %v330_v41 = vld [vmem:[#allocation5 + $0x8] sm:$0xff] }
  0xd2   :  { %v207_v20 = vld [vmem:[#allocation5] sm:$0xff] }
  0xd3   :  { %v282_v21 = vadd.f32 %v278_v17, %v207_v20 }
  0xd4   :  { %v2390_v63 = vpop.f32.mrf.mxu0 }
  0xd5   :  { %v2230_v22 = vmul.f32 -1.442695, %v282_v21  ;;  %v169_v1 = vadd.f32 %v2390_v63, %v2846_v12 }
  0xd6   :  { %v163_v3 = vpop.f32.mrf.mxu0 }
  0xd7   :  { %2609 = vpow2.f32 %v2230_v22  ;;  %196 = vst.msk [vmem:[#allocation5 + $0x18] sm:$0xff] %vm192_vm3, %v169_v1  ;;  %v164_v5 = vadd.f32 %v2846_v12, %v163_v3 }
  0xd8   :  { %v2393_v6 = vpop.f32.mrf.mxu0 }
  0xd9   :  { %195 = vst.msk [vmem:[#allocation5 + $0x10] sm:$0xff] %vm192_vm3, %v164_v5  ;;  %v179_v8 = vadd.f32 %v2393_v6, %v2846_v12 }
  0xdb   :  { %198 = vst.msk [vmem:[#allocation5 + $0x28] sm:$0xff] %vm192_vm3, %v179_v8 }
  0xe0   :  { %v440_v21 = vld [vmem:[#allocation5 + $0x10] sm:$0xff] }
  0xe4   :  { %v2610_v23 = vpop.eup %2609 }
  0xe5   :  { %v286_v24 = vadd.f32 1.0, %v2610_v23 }
  0xe7   :  { %2611 = vrcp.f32 %v286_v24 }
  0xf4   :  { %v2612_v25 = vpop.eup %2611 }
 0x13f   :  { %v300_v26 = vpop.permute.xlu0 %299 }
 0x140   :  { %v302_v27 = vmul.f32 %v2612_v25, %v300_v26 }
 0x142   :  { %304 = vrot.lane.b32.xlu1 %v302_v27, %s2707_s15 }
 0x1b4   :  { %v305_v28 = vpop.permute.xlu1 %304 }
 0x1b5   :  { %v307_v29 = vadd.f32 %v305_v28, %v207_v20 }
 0x1b7   :  { %2613 = vtanh.f32 %v307_v29 }
 0x1c4   :  { %v2614_v30 = vpop.eup %2613 }
 0x1c5   :  { %310 = vrot.lane.b32.xlu1 %v2614_v30, %s2707_s15 }
 0x237   :  { %v311_v31 = vpop.permute.xlu1 %310 }
 0x238   :  { %v313_v32 = vsub.f32 %v206_v10, %v311_v31  ;;  %v173_v10 = vpop.f32.mrf.mxu0 }
 0x239   :  { %v174_v11 = vadd.f32 %v2846_v12, %v173_v10 }
 0x23a   :  { %315 = vrot.lane.b32.xlu0 %v313_v32, %s2708_s3  ;;  %v2396_v13 = vpop.f32.mrf.mxu0 }
 0x23b   :  { %197 = vst.msk [vmem:[#allocation5 + $0x20] sm:$0xff] %vm192_vm3, %v174_v11  ;;  %v189_v14 = vadd.f32 %v2396_v13, %v2846_v12 }
 0x23c   :  { %v183_v16 = vpop.f32.mrf.mxu0 }
 0x23d   :  { %200 = vst.msk [vmem:[#allocation5 + $0x38] sm:$0xff] %vm192_vm3, %v189_v14  ;;  %v184_v17 = vadd.f32 %v2846_v12, %v183_v16 }
 0x23f   :  { %199 = vst.msk [vmem:[#allocation5 + $0x30] sm:$0xff] %vm192_vm3, %v184_v17 }
 0x2ac   :  { %v316_v33 = vpop.permute.xlu0 %315 }
 0x2ad   :  { %v318_v34 = vmul.f32 %v2612_v25, %v316_v33 }
 0x2af   :  { %320 = vrot.lane.b32.xlu1 %v318_v34, %s2708_s3 }
 0x321   :  { %v321_v35 = vpop.permute.xlu1 %320 }
 0x322   :  { %v323_v36 = vadd.f32 %v2614_v30, %v321_v35 }
 0x324   :  { %325 = vrot.lane.b32.xlu0 %v323_v36, %s2707_s15 }
 0x396   :  { %v326_v37 = vpop.permute.xlu0 %325 }
 0x397   :  { %328 = vst.msk [vmem:[#allocation3] sm:$0xff] %vm42_vm0, %v326_v37  ;;  %2417 = vmatmul.mubr.msk.f32.vlgmr.msra.gmra.mxu1 %vm42_vm0, %v326_v37 }
 0x398   :  { %2431 = vmatpush3.msra.mxu1 %v2777_v2  ;;  %2438 = vmatprep.mubr.msk.f32.mxu1 %vm2706_vm1, %v2705_v0 }
 0x399   :  { %2432 = vmatprep.subr.mxu1 %v2705_v0 }
 0x39a   :  { %2433 = vmatpush3.msra.mxu1 %v2792_v4 }
 0x39b   :  { %2434 = vmatprep.subr.mxu1 %v2705_v0 }
 0x39c   :  { %2435 = vmatpush3.msra.mxu1 %v2805_v7 }
 0x39d   :  { %2436 = vmatprep.subr.mxu1 %v2705_v0 }
 0x39e   :  { %2437 = vmatpush3.msra.mxu1 %v2816_v9 }
 0x39f   :  { %2452 = vmatprep.subr.mxu1 %v2705_v0 }
 0x457   :  { %v399_v38 = vpop.f32.mrf.mxu1 }
 0x458   :  { %v410_v39 = vadd.f32 %v399_v38, %v2849_v15  ;;  %v403_v42 = vadd.f32 %v399_v38, %v330_v41 }
 0x459   :  { %v2418_v40 = vpop.f32.mrf.mxu1 }
 0x45a   :  { %412 = vrot.lane.b32.xlu1 %v410_v39, %s2707_s15  ;;  %v2233_v43 = vmul.f32 -1.442695, %v403_v42 }
 0x45c   :  { %2615 = vpow2.f32 %v2233_v43 }
 0x469   :  { %v2616_v44 = vpop.eup %2615 }
 0x46a   :  { %v407_v45 = vadd.f32 1.0, %v2616_v44 }
 0x46c   :  { %2617 = vrcp.f32 %v407_v45 }
 0x479   :  { %v2618_v46 = vpop.eup %2617 }
 0x4cc   :  { %v413_v47 = vpop.permute.xlu1 %412 }
 0x4cd   :  { %v415_v48 = vmul.f32 %v2618_v46, %v413_v47 }
 0x4cf   :  { %417 = vrot.lane.b32.xlu0 %v415_v48, %s2707_s15 }
 0x541   :  { %v418_v49 = vpop.permute.xlu0 %417 }
 0x542   :  { %v420_v50 = vadd.f32 %v418_v49, %v330_v41  ;;  %v550_v41 = vld [vmem:[#allocation5 + $0x18] sm:$0xff] }
 0x544   :  { %2619 = vtanh.f32 %v420_v50 }
 0x551   :  { %v2620_v51 = vpop.eup %2619 }
 0x552   :  { %v422_v52 = vsub.f32 %v323_v36, %v2620_v51 }
 0x554   :  { %424 = vrot.lane.b32.xlu1 %v422_v52, %s2709_s16 }
 0x5c6   :  { %v425_v59 = vpop.permute.xlu1 %424 }
 0x5c7   :  { %v427_v60 = vmul.f32 %v2618_v46, %v425_v59 }
 0x5c9   :  { %429 = vrot.lane.b32.xlu0 %v427_v60, %s2708_s3 }
 0x63b   :  { %v430_v61 = vpop.permute.xlu0 %429 }
 0x63c   :  { %v432_v62 = vadd.f32 %v2620_v51, %v430_v61  ;;  %v660_v61 = vld [vmem:[#allocation5 + $0x20] sm:$0xff] }
 0x63e   :  { %434 = vrot.lane.b32.xlu1 %v432_v62, %s2707_s15 }
 0x6b0   :  { %v435_v18 = vpop.permute.xlu1 %434 }
 0x6b1   :  { %438 = vst.msk [vmem:[#allocation3 + $0x8] sm:$0xff] %vm42_vm0, %v435_v18  ;;  %2428 = vmatmul.mubr.msk.f32.vlgmr.msra.gmra.mxu0 %vm42_vm0, %v435_v18 }
 0x6b2   :  { %2442 = vmatpush3.msra.mxu0 %v2777_v2  ;;  %2449 = vmatprep.mubr.msk.f32.mxu0 %vm2706_vm1, %v2705_v0 }
 0x6b3   :  { %2443 = vmatprep.subr.mxu0 %v2705_v0 }
 0x6b4   :  { %2444 = vmatpush3.msra.mxu0 %v2792_v4 }
 0x6b5   :  { %2445 = vmatprep.subr.mxu0 %v2705_v0 }
 0x6b6   :  { %2446 = vmatpush3.msra.mxu0 %v2805_v7 }
 0x6b7   :  { %2447 = vmatprep.subr.mxu0 %v2705_v0 }
 0x6b8   :  { %2448 = vmatpush3.msra.mxu0 %v2816_v9 }
 0x6b9   :  { %2463 = vmatprep.subr.mxu0 %v2705_v0 }
 0x771   :  { %v509_v12 = vpop.f32.mrf.mxu0 }
 0x772   :  { %v520_v19 = vadd.f32 %v509_v12, %v2849_v15  ;;  %v513_v22 = vadd.f32 %v509_v12, %v440_v21 }
 0x773   :  { %v2429_v20 = vpop.f32.mrf.mxu0 }
 0x774   :  { %522 = vrot.lane.b32.xlu0 %v520_v19, %s2707_s15  ;;  %v2235_v23 = vmul.f32 -1.442695, %v513_v22  ;;  %v770_v22 = vld [vmem:[#allocation5 + $0x28] sm:$0xff] }
 0x776   :  { %2621 = vpow2.f32 %v2235_v23 }
 0x783   :  { %v2622_v24 = vpop.eup %2621 }
 0x784   :  { %v517_v25 = vadd.f32 1.0, %v2622_v24 }
 0x786   :  { %2623 = vrcp.f32 %v517_v25 }
 0x793   :  { %v2624_v26 = vpop.eup %2623 }
 0x7e6   :  { %v523_v27 = vpop.permute.xlu0 %522 }
 0x7e7   :  { %v525_v28 = vmul.f32 %v2624_v26, %v523_v27 }
 0x7e9   :  { %527 = vrot.lane.b32.xlu1 %v525_v28, %s2707_s15 }
 0x85b   :  { %v528_v29 = vpop.permute.xlu1 %527 }
 0x85c   :  { %v530_v30 = vadd.f32 %v528_v29, %v440_v21 }
 0x85e   :  { %2625 = vtanh.f32 %v530_v30 }
 0x86b   :  { %v2626_v31 = vpop.eup %2625 }
 0x86c   :  { %v532_v32 = vsub.f32 %v432_v62, %v2626_v31 }
 0x86e   :  { %534 = vrot.lane.b32.xlu0 %v532_v32, %s2709_s16 }
 0x8e0   :  { %v535_v33 = vpop.permute.xlu0 %534 }
 0x8e1   :  { %v537_v34 = vmul.f32 %v2624_v26, %v535_v33 }
 0x8e3   :  { %539 = vrot.lane.b32.xlu1 %v537_v34, %s2708_s3 }
 0x955   :  { %v540_v35 = vpop.permute.xlu1 %539 }
 0x956   :  { %v542_v36 = vadd.f32 %v2626_v31, %v540_v35  ;;  %v1111_v31 = vld [vmem:[%s3248_s5 + $0x18] sm:$0xff] }
 0x958   :  { %544 = vrot.lane.b32.xlu0 %v542_v36, %s2707_s15 }
 0x9ca   :  { %v545_v37 = vpop.permute.xlu0 %544 }
 0x9cb   :  { %548 = vst.msk [vmem:[#allocation3 + $0x10] sm:$0xff] %vm42_vm0, %v545_v37  ;;  %2439 = vmatmul.mubr.msk.f32.vlgmr.msra.gmra.mxu1 %vm42_vm0, %v545_v37  ;;  %v1110_v37 = vld [vmem:[%s3248_s5 + $0x10] sm:$0xff] }
 0x9cc   :  { %2453 = vmatpush3.msra.mxu1 %v2777_v2  ;;  %2460 = vmatprep.mubr.msk.f32.mxu1 %vm2706_vm1, %v2705_v0 }
 0x9cd   :  { %2454 = vmatprep.subr.mxu1 %v2705_v0 }
 0x9ce   :  { %2455 = vmatpush3.msra.mxu1 %v2792_v4 }
 0x9cf   :  { %2456 = vmatprep.subr.mxu1 %v2705_v0 }
 0x9d0   :  { %2457 = vmatpush3.msra.mxu1 %v2805_v7 }
 0x9d1   :  { %2458 = vmatprep.subr.mxu1 %v2705_v0 }
 0x9d2   :  { %2459 = vmatpush3.msra.mxu1 %v2816_v9 }
 0x9d3   :  { %2474 = vmatprep.subr.mxu1 %v2705_v0 }
 0xa8b   :  { %v619_v38 = vpop.f32.mrf.mxu1 }
 0xa8c   :  { %v630_v39 = vadd.f32 %v619_v38, %v2849_v15  ;;  %v623_v42 = vadd.f32 %v619_v38, %v550_v41  ;;  %v1100_v38 = vld [vmem:[#allocation3] sm:$0xff] }
 0xa8d   :  { %v2440_v40 = vpop.f32.mrf.mxu1 }
 0xa8e   :  { %632 = vrot.lane.b32.xlu1 %v630_v39, %s2707_s15  ;;  %v2237_v43 = vmul.f32 -1.442695, %v623_v42  ;;  %v1109_v39 = vld [vmem:[%s3248_s5 + $0x8] sm:$0xff]  ;;  %v1108_v40 = vld [vmem:[%s3248_s5] sm:$0xff] }
 0xa8f   :  { %v1102_v42 = vld [vmem:[#allocation3 + $0x10] sm:$0xff] }
 0xa90   :  { %2627 = vpow2.f32 %v2237_v43 }
 0xa9d   :  { %v2628_v44 = vpop.eup %2627 }
 0xa9e   :  { %v627_v45 = vadd.f32 1.0, %v2628_v44 }
 0xaa0   :  { %2629 = vrcp.f32 %v627_v45 }
 0xaad   :  { %v2630_v46 = vpop.eup %2629 }
 0xb00   :  { %v633_v47 = vpop.permute.xlu1 %632 }
 0xb01   :  { %v635_v48 = vmul.f32 %v2630_v46, %v633_v47 }
 0xb03   :  { %637 = vrot.lane.b32.xlu0 %v635_v48, %s2707_s15 }
 0xb75   :  { %v638_v49 = vpop.permute.xlu0 %637 }
 0xb76   :  { %v640_v50 = vadd.f32 %v638_v49, %v550_v41  ;;  %v1101_v41 = vld [vmem:[#allocation3 + $0x8] sm:$0xff]  ;;  %v3017_v49 = vld [vmem:[%s3249_s7] ss:$0 sm:$0xff] }
 0xb78   :  { %2631 = vtanh.f32 %v640_v50 }
 0xb85   :  { %v2632_v51 = vpop.eup %2631 }
 0xb86   :  { %v642_v52 = vsub.f32 %v542_v36, %v2632_v51 }
 0xb88   :  { %644 = vrot.lane.b32.xlu1 %v642_v52, %s2709_s16 }
 0xbfa   :  { %v645_v53 = vpop.permute.xlu1 %644 }
 0xbfb   :  { %v647_v54 = vmul.f32 %v2630_v46, %v645_v53 }
 0xbfd   :  { %649 = vrot.lane.b32.xlu0 %v647_v54, %s2708_s3 }
 0xc6f   :  { %v650_v55 = vpop.permute.xlu0 %649 }
 0xc70   :  { %v652_v56 = vadd.f32 %v2632_v51, %v650_v55 }
 0xc72   :  { %654 = vrot.lane.b32.xlu1 %v652_v56, %s2707_s15 }
 0xce4   :  { %v655_v57 = vpop.permute.xlu1 %654 }
 0xce5   :  { %658 = vst.msk [vmem:[#allocation3 + $0x18] sm:$0xff] %vm42_vm0, %v655_v57  ;;  %2450 = vmatmul.mubr.msk.f32.vlgmr.msra.gmra.mxu0 %vm42_vm0, %v655_v57 }
 0xce6   :  { %2464 = vmatpush3.msra.mxu0 %v2777_v2  ;;  %2471 = vmatprep.mubr.msk.f32.mxu0 %vm2706_vm1, %v2705_v0 }
 0xce7   :  { %2465 = vmatprep.subr.mxu0 %v2705_v0 }
 0xce8   :  { %2466 = vmatpush3.msra.mxu0 %v2792_v4 }
 0xce9   :  { %2467 = vmatprep.subr.mxu0 %v2705_v0 }
 0xcea   :  { %2468 = vmatpush3.msra.mxu0 %v2805_v7 }
 0xceb   :  { %2469 = vmatprep.subr.mxu0 %v2705_v0 }
 0xcec   :  { %2470 = vmatpush3.msra.mxu0 %v2816_v9  ;;  %v1103_v43 = vld [vmem:[#allocation3 + $0x18] sm:$0xff] }
 0xced   :  { %2485 = vmatprep.subr.mxu0 %v1111_v31 }
 0xda5   :  { %v729_v58 = vpop.f32.mrf.mxu0 }
 0xda6   :  { %v740_v59 = vadd.f32 %v729_v58, %v2849_v15  ;;  %v733_v62 = vadd.f32 %v729_v58, %v660_v61 }
 0xda7   :  { %v2451_v60 = vpop.f32.mrf.mxu0 }
 0xda8   :  { %742 = vrot.lane.b32.xlu0 %v740_v59, %s2707_s15  ;;  %v2239_v63 = vmul.f32 -1.442695, %v733_v62  ;;  %v880_v62 = vld [vmem:[#allocation5 + $0x30] sm:$0xff] }
 0xdaa   :  { %2633 = vpow2.f32 %v2239_v63 }
 0xdb7   :  { %v2634_v1 = vpop.eup %2633 }
 0xdb8   :  { %v737_v3 = vadd.f32 1.0, %v2634_v1 }
 0xdba   :  { %2635 = vrcp.f32 %v737_v3 }
 0xdc7   :  { %v2636_v5 = vpop.eup %2635 }
 0xe1a   :  { %v743_v6 = vpop.permute.xlu0 %742 }
 0xe1b   :  { %v745_v8 = vmul.f32 %v2636_v5, %v743_v6 }
 0xe1d   :  { %747 = vrot.lane.b32.xlu1 %v745_v8, %s2707_s15 }
 0xe8f   :  { %v748_v10 = vpop.permute.xlu1 %747 }
 0xe90   :  { %v750_v11 = vadd.f32 %v748_v10, %v660_v61 }
 0xe92   :  { %2637 = vtanh.f32 %v750_v11 }
 0xe9f   :  { %v2638_v13 = vpop.eup %2637 }
 0xea0   :  { %v752_v14 = vsub.f32 %v652_v56, %v2638_v13 }
 0xea2   :  { %754 = vrot.lane.b32.xlu0 %v752_v14, %s2709_s16 }
 0xf14   :  { %v755_v16 = vpop.permute.xlu0 %754 }
 0xf15   :  { %v757_v17 = vmul.f32 %v2636_v5, %v755_v16 }
 0xf17   :  { %759 = vrot.lane.b32.xlu1 %v757_v17, %s2708_s3 }
 0xf89   :  { %v760_v18 = vpop.permute.xlu1 %759 }
 0xf8a   :  { %v762_v12 = vadd.f32 %v2638_v13, %v760_v18 }
 0xf8c   :  { %764 = vrot.lane.b32.xlu0 %v762_v12, %s2707_s15 }
 0xffe   :  { %v765_v19 = vpop.permute.xlu0 %764 }
 0xfff   :  { %768 = vst.msk [vmem:[#allocation3 + $0x20] sm:$0xff] %vm42_vm0, %v765_v19  ;;  %2461 = vmatmul.mubr.msk.f32.vlgmr.msra.gmra.mxu1 %vm42_vm0, %v765_v19  ;;  %v3044_v19 = vld [vmem:[%s3250_s6 + $0x10] sm:$0xff] }
0x1000   :  { %2475 = vmatpush3.msra.mxu1 %v2777_v2  ;;  %2482 = vmatprep.mubr.msk.f32.mxu1 %vm2706_vm1, %v2705_v0 }
0x1001   :  { %2476 = vmatprep.subr.mxu1 %v2705_v0 }
0x1002   :  { %2477 = vmatpush3.msra.mxu1 %v2792_v4 }
0x1003   :  { %2478 = vmatprep.subr.mxu1 %v2705_v0 }
0x1004   :  { %2479 = vmatpush3.msra.mxu1 %v2805_v7 }
0x1005   :  { %2480 = vmatprep.subr.mxu1 %v2705_v0 }
0x1006   :  { %2481 = vmatpush3.msra.mxu1 %v2816_v9  ;;  %v1104_v44 = vld [vmem:[#allocation3 + $0x20] sm:$0xff] }
0x1007   :  { %2505 = vmatprep.subr.mxu1 %v2705_v0 }
0x10bf   :  { %v839_v20 = vpop.f32.mrf.mxu1 }
0x10c0   :  { %v850_v2 = vadd.f32 %v839_v20, %v2849_v15  ;;  %v843_v23 = vadd.f32 %v839_v20, %v770_v22  ;;  %v3051_v20 = vld [vmem:[%s3250_s6 + $0x8] sm:$0xff] }
0x10c1   :  { %v2462_v21 = vpop.f32.mrf.mxu1 }
0x10c2   :  { %852 = vrot.lane.b32.xlu1 %v850_v2, %s2707_s15  ;;  %v2241_v24 = vmul.f32 -1.442695, %v843_v23  ;;  %v3058_v2 = vld [vmem:[%s3250_s6] sm:$0xff] }
0x10c3   :  { %v2257_v21 = vld [vmem:[%s3251_s8] ss:$0 sm:$0xff] }
0x10c4   :  { %2639 = vpow2.f32 %v2241_v24 }
0x10d1   :  { %v2640_v4 = vpop.eup %2639 }
0x10d2   :  { %v847_v25 = vadd.f32 1.0, %v2640_v4  ;;  %v1262_v4 = vld [vmem:[#allocation2 + $0x8] sm:$0xff] }
0x10d4   :  { %2641 = vrcp.f32 %v847_v25 }
0x10e1   :  { %v2642_v7 = vpop.eup %2641 }
0x1134   :  { %v853_v26 = vpop.permute.xlu1 %852 }
0x1135   :  { %v855_v27 = vmul.f32 %v2642_v7, %v853_v26 }
0x1137   :  { %857 = vrot.lane.b32.xlu0 %v855_v27, %s2707_s15 }
0x11a9   :  { %v858_v9 = vpop.permute.xlu0 %857 }
0x11aa   :  { %v860_v28 = vadd.f32 %v858_v9, %v770_v22 }
0x11ac   :  { %2643 = vtanh.f32 %v860_v28 }
0x11b9   :  { %v2644_v29 = vpop.eup %2643 }
0x11ba   :  { %v862_v30 = vsub.f32 %v762_v12, %v2644_v29  ;;  %v3038_v12 = vld [vmem:[%s3250_s6 + $0x18] sm:$0xff] }
0x11bc   :  { %864 = vrot.lane.b32.xlu1 %v862_v30, %s2709_s16 }
0x122e   :  { %v865_v32 = vpop.permute.xlu1 %864 }
0x122f   :  { %v867_v33 = vmul.f32 %v2642_v7, %v865_v32 }
0x1231   :  { %869 = vrot.lane.b32.xlu0 %v867_v33, %s2708_s3 }
0x12a3   :  { %v870_v34 = vpop.permute.xlu0 %869 }
0x12a4   :  { %v2990_v35 = vadd.f32 %v2644_v29, %v870_v34 }
0x12a6   :  { %874 = vrot.lane.b32.xlu1 %v2990_v35, %s2707_s15 }
0x1318   :  { %v875_v36 = vpop.permute.xlu1 %874 }
0x1319   :  { %878 = vst.msk [vmem:[#allocation3 + $0x28] sm:$0xff] %vm42_vm0, %v875_v36  ;;  %2472 = vmatmul.mubr.msk.f32.vlgmr.msra.gmra.mxu0 %vm42_vm0, %v875_v36 }
0x131a   :  { %2486 = vmatpush3.msra.mxu0 %v1111_v31  ;;  %2493 = vmatprep.mubr.msk.f32.mxu0 %vm42_vm0, %v1100_v38 }
0x131b   :  { %2487 = vmatprep.subr.mxu0 %v1110_v37 }
0x131c   :  { %2488 = vmatpush3.msra.mxu0 %v1110_v37 }
0x131d   :  { %2489 = vmatprep.subr.mxu0 %v1109_v39 }
0x131e   :  { %2490 = vmatpush3.msra.mxu0 %v1109_v39 }
0x131f   :  { %2491 = vmatprep.subr.mxu0 %v1108_v40 }
0x1320   :  { %2492 = vmatpush3.msra.mxu0 %v1108_v40  ;;  %v1105_v45 = vld [vmem:[#allocation3 + $0x28] sm:$0xff] }
0x1321   :  { %2494 = vmatmul.mubr.msk.f32.vlgmr.msra.gmra.mxu0 %vm42_vm0, %v1101_v41  ;;  %2527 = vmatprep.subr.mxu0 %v2705_v0 }
0x1322   :  { %2496 = vmatprep.mubr.msk.f32.mxu0 %vm42_vm0, %v1102_v42  ;;  %2528 = vmatpush3.msra.mxu0 %v3038_v12 }
0x1323   :  { %2529 = vmatprep.subr.mxu0 %v2705_v0 }
0x1324   :  { %2530 = vmatpush3.msra.mxu0 %v3044_v19 }
0x1325   :  { %2497 = vmatmul.mubr.msk.f32.gmra.mxu0 %vm42_vm0, %v1103_v43  ;;  %2531 = vmatprep.subr.mxu0 %v2705_v0 }
0x1326   :  { %2499 = vmatprep.mubr.msk.f32.mxu0 %vm42_vm0, %v1104_v44  ;;  %2532 = vmatpush3.msra.mxu0 %v3051_v20 }
0x1327   :  { %2533 = vmatprep.subr.mxu0 %v2705_v0 }
0x1328   :  { %2534 = vmatpush3.msra.mxu0 %v3058_v2 }
0x1329   :  { %2500 = vmatmul.mubr.msk.f32.gmra.mxu0 %vm42_vm0, %v1105_v45  ;;  %2549 = vmatprep.subr.mxu0 %v2705_v0 }
0x13d9   :  { %v949_v46 = vpop.f32.mrf.mxu0 }
0x13da   :  { %v960_v47 = vadd.f32 %v949_v46, %v2849_v15  ;;  %v953_v63 = vadd.f32 %v949_v46, %v880_v62  ;;  %v990_v46 = vld [vmem:[#allocation5 + $0x38] sm:$0xff] }
0x13db   :  { %v2473_v48 = vpop.f32.mrf.mxu0 }
0x13dc   :  { %962 = vrot.lane.b32.xlu0 %v960_v47, %s2707_s15  ;;  %v2243_v1 = vmul.f32 -1.442695, %v953_v63 }
0x13de   :  { %2645 = vpow2.f32 %v2243_v1 }
0x13e1   :  { %v2495_v50 = vpop.f32.mrf.mxu0 }
0x13e2   :  { %v1215_v51 = vadd.f32 %v2495_v50, %v3017_v49 }
0x13e3   :  { %v1209_v52 = vpop.f32.mrf.mxu0 }
0x13e4   :  { %1249 = vst.msk [vmem:[#allocation5 + $0x8] sm:$0xff] %vm192_vm3, %v1215_v51  ;;  %v1210_v53 = vadd.f32 %v3017_v49, %v1209_v52 }
0x13e5   :  { %v2498_v54 = vpop.f32.mrf.mxu0 }
0x13e6   :  { %1248 = vst.msk [vmem:[#allocation5] sm:$0xff] %vm192_vm3, %v1210_v53  ;;  %v1225_v55 = vadd.f32 %v2498_v54, %v3017_v49 }
0x13e7   :  { %v1219_v56 = vpop.f32.mrf.mxu0 }
0x13e8   :  { %1251 = vst.msk [vmem:[#allocation5 + $0x18] sm:$0xff] %vm192_vm3, %v1225_v55  ;;  %v1220_v57 = vadd.f32 %v3017_v49, %v1219_v56 }
0x13e9   :  { %v2501_v58 = vpop.f32.mrf.mxu0 }
0x13ea   :  { %1250 = vst.msk [vmem:[#allocation5 + $0x10] sm:$0xff] %vm192_vm3, %v1220_v57  ;;  %v1235_v59 = vadd.f32 %v2501_v58, %v3017_v49 }
0x13eb   :  { %v1229_v60 = vpop.f32.mrf.mxu0  ;;  %v2646_v3 = vpop.eup %2645 }
0x13ec   :  { %1253 = vst.msk [vmem:[#allocation5 + $0x28] sm:$0xff] %vm192_vm3, %v1235_v59  ;;  %v1230_v61 = vadd.f32 %v3017_v49, %v1229_v60  ;;  %v957_v5 = vadd.f32 1.0, %v2646_v3 }
0x13ed   :  { %v1263_v30 = vld [vmem:[#allocation5] sm:$0xff] }
0x13ee   :  { %1252 = vst.msk [vmem:[#allocation5 + $0x20] sm:$0xff] %vm192_vm3, %v1230_v61  ;;  %2647 = vrcp.f32 %v957_v5 }
0x13fb   :  { %v2648_v6 = vpop.eup %2647 }
0x144e   :  { %v963_v8 = vpop.permute.xlu0 %962 }
0x144f   :  { %v965_v10 = vmul.f32 %v2648_v6, %v963_v8  ;;  %v1379_v8 = vld [vmem:[#allocation5 + $0x8] sm:$0xff] }
0x1451   :  { %967 = vrot.lane.b32.xlu1 %v965_v10, %s2707_s15 }
0x14c3   :  { %v968_v11 = vpop.permute.xlu1 %967 }
0x14c4   :  { %v970_v13 = vadd.f32 %v968_v11, %v880_v62 }
0x14c6   :  { %2649 = vtanh.f32 %v970_v13 }
0x14d3   :  { %v2650_v14 = vpop.eup %2649 }
0x14d4   :  { %v972_v16 = vsub.f32 %v2990_v35, %v2650_v14 }
0x14d6   :  { %974 = vrot.lane.b32.xlu0 %v972_v16, %s2709_s16 }
0x1548   :  { %v975_v17 = vpop.permute.xlu0 %974 }
0x1549   :  { %v977_v18 = vmul.f32 %v2648_v6, %v975_v17 }
0x154b   :  { %979 = vrot.lane.b32.xlu1 %v977_v18, %s2708_s3 }
0x154f   :  { %1349 = vrot.lane.b32.xlu1 %v2257_v21, %s2707_s15 }
0x15bd   :  { %v980_v22 = vpop.permute.xlu1 %979 }
0x15be   :  { %v3067_v23 = vadd.f32 %v2650_v14, %v980_v22 }
0x15c0   :  { %984 = vrot.lane.b32.xlu0 %v3067_v23, %s2707_s15 }
0x15c1   :  { %v3095_v27 = vpop.permute.xlu1 %1349 }
0x1632   :  { %v985_v24 = vpop.permute.xlu0 %984 }
0x1633   :  { %988 = vst.msk [vmem:[#allocation3 + $0x30] sm:$0xff] %vm42_vm0, %v985_v24  ;;  %2483 = vmatmul.mubr.msk.f32.vlgmr.msra.gmra.mxu1 %vm42_vm0, %v985_v24 }
0x1634   :  { %2506 = vmatpush3.msra.mxu1 %v3038_v12  ;;  %2513 = vmatprep.mubr.msk.f32.mxu1 %vm2706_vm1, %v2705_v0 }
0x1635   :  { %2507 = vmatprep.subr.mxu1 %v2705_v0 }
0x1636   :  { %2508 = vmatpush3.msra.mxu1 %v3044_v19 }
0x1637   :  { %2509 = vmatprep.subr.mxu1 %v2705_v0 }
0x1638   :  { %2510 = vmatpush3.msra.mxu1 %v3051_v20 }
0x1639   :  { %2511 = vmatprep.subr.mxu1 %v2705_v0 }
0x163a   :  { %2512 = vmatpush3.msra.mxu1 %v3058_v2  ;;  %v1106_v25 = vld [vmem:[#allocation3 + $0x30] sm:$0xff] }
0x163b   :  { %2514 = vmatmul.mubr.msk.f32.vlgmr.msra.gmra.mxu1 %vm42_vm0, %v1262_v4  ;;  %2502 = vmatprep.mubr.msk.f32.mxu0 %vm42_vm0, %v1106_v25 }
0x163c   :  { %2516 = vmatprep.subr.mxu1 %v2705_v0  ;;  %2524 = vmatprep.mubr.msk.f32.mxu1 %vm2706_vm1, %v2705_v0 }
0x163d   :  { %2517 = vmatpush3.msra.mxu1 %v3038_v12 }
0x163e   :  { %2518 = vmatprep.subr.mxu1 %v2705_v0 }
0x163f   :  { %2519 = vmatpush3.msra.mxu1 %v3044_v19 }
0x1640   :  { %2520 = vmatprep.subr.mxu1 %v2705_v0 }
0x1641   :  { %2521 = vmatpush3.msra.mxu1 %v3051_v20 }
0x1642   :  { %2522 = vmatprep.subr.mxu1 %v2705_v0 }
0x1643   :  { %2523 = vmatpush3.msra.mxu1 %v3058_v2 }
0x1644   :  { %2538 = vmatprep.subr.mxu1 %v2705_v0 }
0x16f3   :  { %v1059_v7 = vpop.f32.mrf.mxu1 }
0x16f4   :  { %v1070_v45 = vadd.f32 %v1059_v7, %v2849_v15  ;;  %v1063_v47 = vadd.f32 %v1059_v7, %v990_v46 }
0x16f5   :  { %v2484_v26 = vpop.f32.mrf.mxu1 }
0x16f6   :  { %v2245_v48 = vmul.f32 -1.442695, %v1063_v47 }
0x16fb   :  { %v1333_v9 = vpop.f32.mrf.mxu1 }
0x16fc   :  { %v1352_v28 = vadd.f32 %v3095_v27, %v1333_v9  ;;  %v1337_v31 = vadd.f32 %v1333_v9, %v1263_v30 }
0x16fd   :  { %v2515_v29 = vpop.f32.mrf.mxu1 }
0x16fe   :  { %1354 = vrot.lane.b32.xlu0 %v1352_v28, %s2707_s15  ;;  %v2256_v32 = vmul.f32 -1.442695, %v1337_v31 }
0x1700   :  { %2651 = vpow2.f32 %v2256_v32 }
0x170d   :  { %v2652_v33 = vpop.eup %2651 }
0x170e   :  { %v1341_v34 = vadd.f32 1.0, %v2652_v33 }
0x1710   :  { %2653 = vrcp.f32 %v1341_v34 }
0x171d   :  { %v2654_v35 = vpop.eup %2653 }
0x1770   :  { %v1355_v36 = vpop.permute.xlu0 %1354 }
0x1771   :  { %v1357_v37 = vmul.f32 %v2654_v35, %v1355_v36  ;;  %v1485_v36 = vld [vmem:[#allocation5 + $0x10] sm:$0xff] }
0x1773   :  { %1359 = vrot.lane.b32.xlu1 %v1357_v37, %s2707_s15 }
0x17e5   :  { %v1360_v38 = vpop.permute.xlu1 %1359 }
0x17e6   :  { %v1362_v39 = vadd.f32 %v1360_v38, %v1263_v30 }
0x17e8   :  { %2655 = vtanh.f32 %v1362_v39 }
0x17e9   :  { %2657 = vpow2.f32 %v2245_v48 }
0x17f5   :  { %v2656_v40 = vpop.eup %2655 }
0x17f6   :  { %1365 = vrot.lane.b32.xlu0 %v2656_v40, %s2707_s15  ;;  %v2658_v50 = vpop.eup %2657 }
0x17f7   :  { %v1067_v51 = vadd.f32 1.0, %v2658_v50 }
0x17f9   :  { %2659 = vrcp.f32 %v1067_v51 }
0x1806   :  { %v2660_v54 = vpop.eup %2659 }
0x1868   :  { %v1366_v41 = vpop.permute.xlu0 %1365 }
0x1869   :  { %v1368_v42 = vsub.f32 %v1262_v4, %v1366_v41 }
0x186b   :  { %1370 = vrot.lane.b32.xlu1 %v1368_v42, %s2708_s3 }
0x18dd   :  { %v1371_v43 = vpop.permute.xlu1 %1370 }
0x18de   :  { %v1373_v44 = vmul.f32 %v2654_v35, %v1371_v43 }
0x18e0   :  { %1375 = vrot.lane.b32.xlu0 %v1373_v44, %s2708_s3 }
0x18e4   :  { %1072 = vrot.lane.b32.xlu0 %v1070_v45, %s2707_s15 }
0x1952   :  { %v1376_v52 = vpop.permute.xlu0 %1375 }
0x1953   :  { %v1378_v53 = vadd.f32 %v2656_v40, %v1376_v52 }
0x1955   :  { %1381 = vrot.lane.b32.xlu1 %v1378_v53, %s2707_s15 }
0x1956   :  { %v1073_v55 = vpop.permute.xlu0 %1072 }
0x1957   :  { %v1075_v56 = vmul.f32 %v2660_v54, %v1073_v55 }
0x1959   :  { %1077 = vrot.lane.b32.xlu0 %v1075_v56, %s2707_s15 }
0x19c7   :  { %v1382_v57 = vpop.permute.xlu1 %1381 }
0x19c8   :  { %2525 = vmatmul.mubr.msk.f32.vlgmr.msra.gmra.mxu1 %vm42_vm0, %v1382_v57  ;;  %v1591_v57 = vld [vmem:[#allocation5 + $0x18] sm:$0xff] }
0x19c9   :  { %2539 = vmatpush3.msra.mxu1 %v3038_v12  ;;  %2546 = vmatprep.mubr.msk.f32.mxu1 %vm2706_vm1, %v2705_v0 }
0x19ca   :  { %2540 = vmatprep.subr.mxu1 %v2705_v0 }
0x19cb   :  { %v1078_v15 = vpop.permute.xlu0 %1077  ;;  %2541 = vmatpush3.msra.mxu1 %v3044_v19 }
0x19cc   :  { %v1080_v58 = vadd.f32 %v1078_v15, %v990_v46  ;;  %2542 = vmatprep.subr.mxu1 %v2705_v0 }
0x19cd   :  { %2543 = vmatpush3.msra.mxu1 %v3051_v20 }
0x19ce   :  { %2661 = vtanh.f32 %v1080_v58  ;;  %2544 = vmatprep.subr.mxu1 %v2705_v0 }
0x19cf   :  { %2545 = vmatpush3.msra.mxu1 %v3058_v2 }
0x19d0   :  { %2560 = vmatprep.subr.mxu1 %v2705_v0 }
0x19db   :  { %v2662_v59 = vpop.eup %2661 }
0x19dc   :  { %v1082_v60 = vsub.f32 %v3067_v23, %v2662_v59 }
0x19de   :  { %1084 = vrot.lane.b32.xlu0 %v1082_v60, %s2709_s16 }
0x1a50   :  { %v1085_v61 = vpop.permute.xlu0 %1084 }
0x1a51   :  { %v1087_v62 = vmul.f32 %v2660_v54, %v1085_v61 }
0x1a53   :  { %1089 = vrot.lane.b32.xlu0 %v1087_v62, %s2708_s3 }
0x1a88   :  { %v1451_v63 = vpop.f32.mrf.mxu1 }
0x1a89   :  { %v1462_v1 = vadd.f32 %v1451_v63, %v3095_v27  ;;  %v1455_v10 = vadd.f32 %v1451_v63, %v1379_v8 }
0x1a8a   :  { %v2526_v3 = vpop.f32.mrf.mxu1 }
0x1a8b   :  { %1464 = vrot.lane.b32.xlu1 %v1462_v1, %s2707_s15  ;;  %v2259_v11 = vmul.f32 -1.442695, %v1455_v10 }
0x1a8d   :  { %2663 = vpow2.f32 %v2259_v11 }
0x1a9a   :  { %v2664_v13 = vpop.eup %2663 }
0x1a9b   :  { %v1459_v14 = vadd.f32 1.0, %v2664_v13 }
0x1a9d   :  { %2665 = vrcp.f32 %v1459_v14 }
0x1aaa   :  { %v2666_v16 = vpop.eup %2665 }
0x1ac5   :  { %v1090_v5 = vpop.permute.xlu0 %1089 }
0x1ac6   :  { %v1092_v6 = vadd.f32 %v2662_v59, %v1090_v5 }
0x1ac8   :  { %1094 = vrot.lane.b32.xlu0 %v1092_v6, %s2707_s15 }
0x1afd   :  { %v1465_v17 = vpop.permute.xlu1 %1464 }
0x1afe   :  { %v1467_v18 = vmul.f32 %v2666_v16, %v1465_v17 }
0x1b00   :  { %1469 = vrot.lane.b32.xlu1 %v1467_v18, %s2707_s15 }
0x1b3a   :  { %v1095_v21 = vpop.permute.xlu0 %1094 }
0x1b3b   :  { %1098 = vst.msk [vmem:[#allocation3 + $0x38] sm:$0xff] %vm42_vm0, %v1095_v21  ;;  %1099 = vst.msk [vmem:[#allocation2] sm:$0xff] %vm42_vm0, %v1095_v21  ;;  %v1697_v21 = vld [vmem:[#allocation5 + $0x20] sm:$0xff] }
0x1b42   :  { %v1107_v22 = vld [vmem:[#allocation3 + $0x38] sm:$0xff] }
0x1b43   :  { %2503 = vmatmul.mubr.msk.f32.gmra.mxu0 %vm42_vm0, %v1107_v22 }
0x1b44   :  { %2535 = vmatprep.mubr.msk.f32.mxu0 %vm2706_vm1, %v2705_v0 }
0x1b72   :  { %v1470_v23 = vpop.permute.xlu1 %1469 }
0x1b73   :  { %v1472_v24 = vadd.f32 %v1470_v23, %v1379_v8 }
0x1b75   :  { %2667 = vtanh.f32 %v1472_v24 }
0x1b82   :  { %v2668_v4 = vpop.eup %2667 }
0x1b83   :  { %v1474_v25 = vsub.f32 %v1378_v53, %v2668_v4 }
0x1b85   :  { %1476 = vrot.lane.b32.xlu1 %v1474_v25, %s2709_s16 }
0x1bf7   :  { %v1477_v7 = vpop.permute.xlu1 %1476 }
0x1bf8   :  { %v1479_v26 = vmul.f32 %v2666_v16, %v1477_v7 }
0x1bfa   :  { %1481 = vrot.lane.b32.xlu1 %v1479_v26, %s2708_s3 }
0x1c03   :  { %v2504_v9 = vpop.f32.mrf.mxu0 }
0x1c04   :  { %v1245_v28 = vadd.f32 %v2504_v9, %v3017_v49 }
0x1c05   :  { %v1239_v29 = vpop.f32.mrf.mxu0 }
0x1c06   :  { %1255 = vst.msk [vmem:[#allocation5 + $0x38] sm:$0xff] %vm192_vm3, %v1245_v28  ;;  %v1240_v30 = vadd.f32 %v3017_v49, %v1239_v29 }
0x1c08   :  { %1254 = vst.msk [vmem:[#allocation5 + $0x30] sm:$0xff] %vm192_vm3, %v1240_v30 }
0x1c6c   :  { %v1482_v31 = vpop.permute.xlu1 %1481 }
0x1c6d   :  { %v1484_v32 = vadd.f32 %v2668_v4, %v1482_v31 }
0x1c6f   :  { %1487 = vrot.lane.b32.xlu1 %v1484_v32, %s2707_s15 }
0x1ce1   :  { %v1488_v33 = vpop.permute.xlu1 %1487 }
0x1ce2   :  { %2536 = vmatmul.mubr.msk.f32.vlgmr.msra.gmra.mxu0 %vm42_vm0, %v1488_v33 }
0x1ce3   :  { %2550 = vmatpush3.msra.mxu0 %v3038_v12  ;;  %2557 = vmatprep.mubr.msk.f32.mxu0 %vm2706_vm1, %v2705_v0 }
0x1ce4   :  { %2551 = vmatprep.subr.mxu0 %v2705_v0 }
0x1ce5   :  { %2552 = vmatpush3.msra.mxu0 %v3044_v19 }
0x1ce6   :  { %2553 = vmatprep.subr.mxu0 %v2705_v0 }
0x1ce7   :  { %2554 = vmatpush3.msra.mxu0 %v3051_v20 }
0x1ce8   :  { %2555 = vmatprep.subr.mxu0 %v2705_v0 }
0x1ce9   :  { %2556 = vmatpush3.msra.mxu0 %v3058_v2 }
0x1cea   :  { %2571 = vmatprep.subr.mxu0 %v2705_v0 }
0x1da2   :  { %v1557_v49 = vpop.f32.mrf.mxu0 }
0x1da3   :  { %v1568_v34 = vadd.f32 %v1557_v49, %v3095_v27  ;;  %v1561_v37 = vadd.f32 %v1557_v49, %v1485_v36 }
0x1da4   :  { %v2537_v35 = vpop.f32.mrf.mxu0 }
0x1da5   :  { %1570 = vrot.lane.b32.xlu0 %v1568_v34, %s2707_s15  ;;  %v2261_v38 = vmul.f32 -1.442695, %v1561_v37 }
0x1da7   :  { %2669 = vpow2.f32 %v2261_v38 }
0x1db4   :  { %v2670_v39 = vpop.eup %2669 }
0x1db5   :  { %v1565_v40 = vadd.f32 1.0, %v2670_v39 }
0x1db7   :  { %2671 = vrcp.f32 %v1565_v40 }
0x1dc4   :  { %v2672_v41 = vpop.eup %2671 }
0x1e17   :  { %v1571_v42 = vpop.permute.xlu0 %1570 }
0x1e18   :  { %v1573_v43 = vmul.f32 %v2672_v41, %v1571_v42 }
0x1e1a   :  { %1575 = vrot.lane.b32.xlu1 %v1573_v43, %s2707_s15 }
0x1e8c   :  { %v1576_v44 = vpop.permute.xlu1 %1575 }
0x1e8d   :  { %v1578_v45 = vadd.f32 %v1576_v44, %v1485_v36 }
0x1e8f   :  { %2673 = vtanh.f32 %v1578_v45 }
0x1e9c   :  { %v2674_v46 = vpop.eup %2673 }
0x1e9d   :  { %v1580_v47 = vsub.f32 %v1484_v32, %v2674_v46 }
0x1e9f   :  { %1582 = vrot.lane.b32.xlu0 %v1580_v47, %s2709_s16 }
0x1f11   :  { %v1583_v48 = vpop.permute.xlu0 %1582 }
0x1f12   :  { %v1585_v50 = vmul.f32 %v2672_v41, %v1583_v48 }
0x1f14   :  { %1587 = vrot.lane.b32.xlu1 %v1585_v50, %s2708_s3 }
0x1f86   :  { %v1588_v51 = vpop.permute.xlu1 %1587 }
0x1f87   :  { %v1590_v52 = vadd.f32 %v2674_v46, %v1588_v51 }
0x1f89   :  { %1593 = vrot.lane.b32.xlu0 %v1590_v52, %s2707_s15 }
0x1ffb   :  { %v1594_v53 = vpop.permute.xlu0 %1593 }
0x1ffc   :  { %2547 = vmatmul.mubr.msk.f32.vlgmr.msra.gmra.mxu1 %vm42_vm0, %v1594_v53 }
0x1ffd   :  { %2561 = vmatpush3.msra.mxu1 %v3038_v12  ;;  %2568 = vmatprep.mubr.msk.f32.mxu1 %vm2706_vm1, %v2705_v0 }
0x1ffe   :  { %2562 = vmatprep.subr.mxu1 %v2705_v0 }
0x1fff   :  { %2563 = vmatpush3.msra.mxu1 %v3044_v19 }
0x2000   :  { %2564 = vmatprep.subr.mxu1 %v2705_v0 }
0x2001   :  { %2565 = vmatpush3.msra.mxu1 %v3051_v20 }
0x2002   :  { %2566 = vmatprep.subr.mxu1 %v2705_v0 }
0x2003   :  { %2567 = vmatpush3.msra.mxu1 %v3058_v2 }
0x2004   :  { %2582 = vmatprep.subr.mxu1 %v2705_v0 }
0x20bc   :  { %v1663_v54 = vpop.f32.mrf.mxu1 }
0x20bd   :  { %v1674_v55 = vadd.f32 %v1663_v54, %v3095_v27  ;;  %v1667_v15 = vadd.f32 %v1663_v54, %v1591_v57 }
0x20be   :  { %v2548_v56 = vpop.f32.mrf.mxu1 }
0x20bf   :  { %1676 = vrot.lane.b32.xlu1 %v1674_v55, %s2707_s15  ;;  %v2263_v58 = vmul.f32 -1.442695, %v1667_v15  ;;  %v1909_v55 = vld [vmem:[#allocation5 + $0x30] sm:$0xff] }
0x20c1   :  { %2675 = vpow2.f32 %v2263_v58 }
0x20ce   :  { %v2676_v59 = vpop.eup %2675 }
0x20cf   :  { %v1671_v60 = vadd.f32 1.0, %v2676_v59 }
0x20d1   :  { %2677 = vrcp.f32 %v1671_v60 }
0x20de   :  { %v2678_v61 = vpop.eup %2677 }
0x2131   :  { %v1677_v62 = vpop.permute.xlu1 %1676 }
0x2132   :  { %v1679_v63 = vmul.f32 %v2678_v61, %v1677_v62 }
0x2134   :  { %1681 = vrot.lane.b32.xlu0 %v1679_v63, %s2707_s15 }
0x21a6   :  { %v1682_v1 = vpop.permute.xlu0 %1681 }
0x21a7   :  { %v1684_v3 = vadd.f32 %v1682_v1, %v1591_v57 }
0x21a9   :  { %2679 = vtanh.f32 %v1684_v3 }
0x21b6   :  { %v2680_v5 = vpop.eup %2679 }
0x21b7   :  { %v1686_v6 = vsub.f32 %v1590_v52, %v2680_v5 }
0x21b9   :  { %1688 = vrot.lane.b32.xlu1 %v1686_v6, %s2709_s16 }
0x222b   :  { %v1689_v8 = vpop.permute.xlu1 %1688 }
0x222c   :  { %v1691_v10 = vmul.f32 %v2678_v61, %v1689_v8 }
0x222e   :  { %1693 = vrot.lane.b32.xlu0 %v1691_v10, %s2708_s3 }
0x22a0   :  { %v1694_v11 = vpop.permute.xlu0 %1693 }
0x22a1   :  { %v1696_v13 = vadd.f32 %v2680_v5, %v1694_v11 }
0x22a3   :  { %1699 = vrot.lane.b32.xlu1 %v1696_v13, %s2707_s15 }
0x2315   :  { %v1700_v14 = vpop.permute.xlu1 %1699 }
0x2316   :  { %2558 = vmatmul.mubr.msk.f32.vlgmr.msra.gmra.mxu0 %vm42_vm0, %v1700_v14 }
0x2317   :  { %2572 = vmatpush3.msra.mxu0 %v3038_v12  ;;  %2579 = vmatprep.mubr.msk.f32.mxu0 %vm2706_vm1, %v2705_v0 }
0x2318   :  { %2573 = vmatprep.subr.mxu0 %v2705_v0 }
0x2319   :  { %2574 = vmatpush3.msra.mxu0 %v3044_v19 }
0x231a   :  { %2575 = vmatprep.subr.mxu0 %v2705_v0 }
0x231b   :  { %2576 = vmatpush3.msra.mxu0 %v3051_v20 }
0x231c   :  { %2577 = vmatprep.subr.mxu0 %v2705_v0 }
0x231d   :  { %2578 = vmatpush3.msra.mxu0 %v3058_v2 }
0x231e   :  { %2593 = vmatprep.subr.mxu0 %v2705_v0 }
0x23d6   :  { %v1769_v16 = vpop.f32.mrf.mxu0 }
0x23d7   :  { %v1780_v17 = vadd.f32 %v1769_v16, %v3095_v27  ;;  %v1773_v22 = vadd.f32 %v1769_v16, %v1697_v21 }
0x23d8   :  { %v2559_v18 = vpop.f32.mrf.mxu0 }
0x23d9   :  { %1782 = vrot.lane.b32.xlu0 %v1780_v17, %s2707_s15  ;;  %v2265_v23 = vmul.f32 -1.442695, %v1773_v22  ;;  %v2015_v17 = vld [vmem:[#allocation5 + $0x38] sm:$0xff] }
0x23db   :  { %2681 = vpow2.f32 %v2265_v23 }
0x23e8   :  { %v2682_v24 = vpop.eup %2681 }
0x23e9   :  { %v1777_v4 = vadd.f32 1.0, %v2682_v24 }
0x23eb   :  { %2683 = vrcp.f32 %v1777_v4 }
0x23f8   :  { %v2684_v25 = vpop.eup %2683 }
0x244b   :  { %v1783_v7 = vpop.permute.xlu0 %1782 }
0x244c   :  { %v1785_v26 = vmul.f32 %v2684_v25, %v1783_v7 }
0x244e   :  { %1787 = vrot.lane.b32.xlu1 %v1785_v26, %s2707_s15 }
0x24c0   :  { %v1788_v9 = vpop.permute.xlu1 %1787 }
0x24c1   :  { %v1790_v28 = vadd.f32 %v1788_v9, %v1697_v21 }
0x24c3   :  { %2685 = vtanh.f32 %v1790_v28 }
0x24d0   :  { %v2686_v29 = vpop.eup %2685 }
0x24d1   :  { %v1792_v30 = vsub.f32 %v1696_v13, %v2686_v29 }
0x24d3   :  { %1794 = vrot.lane.b32.xlu0 %v1792_v30, %s2709_s16  ;;  %v2133_v30 = vld [vmem:[%s3252_s9 + $0x18] sm:$0xff] }
0x2545   :  { %v1795_v31 = vpop.permute.xlu0 %1794 }
0x2546   :  { %v1797_v32 = vmul.f32 %v2684_v25, %v1795_v31  ;;  %v2132_v31 = vld [vmem:[%s3252_s9 + $0x10] sm:$0xff] }
0x2548   :  { %1799 = vrot.lane.b32.xlu1 %v1797_v32, %s2708_s3  ;;  %v2131_v32 = vld [vmem:[%s3252_s9 + $0x8] sm:$0xff] }
0x25ba   :  { %v1800_v33 = vpop.permute.xlu1 %1799 }
0x25bb   :  { %v1802_v49 = vadd.f32 %v2686_v29, %v1800_v33  ;;  %v2130_v33 = vld [vmem:[%s3252_s9] sm:$0xff] }
0x25bd   :  { %1805 = vrot.lane.b32.xlu0 %v1802_v49, %s2707_s15 }
0x262f   :  { %v1806_v34 = vpop.permute.xlu0 %1805 }
0x2630   :  { %2569 = vmatmul.mubr.msk.f32.vlgmr.msra.gmra.mxu1 %vm42_vm0, %v1806_v34 }
0x2631   :  { %2583 = vmatpush3.msra.mxu1 %v3038_v12  ;;  %2590 = vmatprep.mubr.msk.f32.mxu1 %vm2706_vm1, %v2705_v0  ;;  %v1803_v12 = vld [vmem:[#allocation5 + $0x28] sm:$0xff] }
0x2632   :  { %2584 = vmatprep.subr.mxu1 %v2705_v0 }
0x2633   :  { %2585 = vmatpush3.msra.mxu1 %v3044_v19 }
0x2634   :  { %2586 = vmatprep.subr.mxu1 %v2705_v0 }
0x2635   :  { %2587 = vmatpush3.msra.mxu1 %v3051_v20 }
0x2636   :  { %2588 = vmatprep.subr.mxu1 %v2705_v0 }
0x2637   :  { %2589 = vmatpush3.msra.mxu1 %v3058_v2 }
0x26f0   :  { %v1875_v35 = vpop.f32.mrf.mxu1 }
0x26f1   :  { %v1886_v36 = vadd.f32 %v1875_v35, %v3095_v27  ;;  %v1879_v38 = vadd.f32 %v1875_v35, %v1803_v12 }
0x26f2   :  { %v2570_v37 = vpop.f32.mrf.mxu1 }
0x26f3   :  { %1888 = vrot.lane.b32.xlu1 %v1886_v36, %s2707_s15  ;;  %v2267_v39 = vmul.f32 -1.442695, %v1879_v38  ;;  %v2272_v37 = vld [vmem:[%s3253_s10] ss:$0 sm:$0xff] }
0x26f5   :  { %2687 = vpow2.f32 %v2267_v39 }
0x2702   :  { %v2688_v40 = vpop.eup %2687 }
0x2703   :  { %v1883_v19 = vadd.f32 1.0, %v2688_v40 }
0x2705   :  { %2689 = vrcp.f32 %v1883_v19 }
0x2712   :  { %v2690_v41 = vpop.eup %2689 }
0x2765   :  { %v1889_v42 = vpop.permute.xlu1 %1888 }
0x2766   :  { %v1891_v20 = vmul.f32 %v2690_v41, %v1889_v42 }
0x2768   :  { %1893 = vrot.lane.b32.xlu0 %v1891_v20, %s2707_s15 }
0x27da   :  { %v1894_v43 = vpop.permute.xlu0 %1893 }
0x27db   :  { %v1896_v2 = vadd.f32 %v1894_v43, %v1803_v12 }
0x27dd   :  { %2691 = vtanh.f32 %v1896_v2 }
0x27ea   :  { %v2692_v44 = vpop.eup %2691 }
0x27eb   :  { %v1898_v45 = vsub.f32 %v1802_v49, %v2692_v44 }
0x27ed   :  { %1900 = vrot.lane.b32.xlu1 %v1898_v45, %s2709_s16 }
0x285f   :  { %v1901_v46 = vpop.permute.xlu1 %1900 }
0x2860   :  { %v1903_v47 = vmul.f32 %v2690_v41, %v1901_v46 }
0x2862   :  { %1905 = vrot.lane.b32.xlu0 %v1903_v47, %s2708_s3 }
0x28d4   :  { %v1906_v48 = vpop.permute.xlu0 %1905 }
0x28d5   :  { %v1908_v50 = vadd.f32 %v2692_v44, %v1906_v48 }
0x28d7   :  { %1911 = vrot.lane.b32.xlu1 %v1908_v50, %s2707_s15 }
0x2949   :  { %v1912_v51 = vpop.permute.xlu1 %1911 }
0x294a   :  { %2580 = vmatmul.mubr.msk.f32.vlgmr.msra.gmra.mxu0 %vm42_vm0, %v1912_v51 }
0x294b   :  { %2601 = vmatprep.mubr.msk.f32.mxu0 %vm2706_vm1, %v2705_v0  ;;  %2594 = vmatpush3.msra.mxu0 %v2133_v30 }
0x294c   :  { %2595 = vmatprep.subr.mxu0 %v2705_v0 }
0x294d   :  { %2596 = vmatpush3.msra.mxu0 %v2132_v31 }
0x294e   :  { %2597 = vmatprep.subr.mxu0 %v2705_v0 }
0x294f   :  { %2598 = vmatpush3.msra.mxu0 %v2131_v32 }
0x2950   :  { %2599 = vmatprep.subr.mxu0 %v2705_v0 }
0x2951   :  { %2600 = vmatpush3.msra.mxu0 %v2130_v33 }
0x2a0a   :  { %v1981_v52 = vpop.f32.mrf.mxu0 }
0x2a0b   :  { %v1992_v53 = vadd.f32 %v1981_v52, %v3095_v27  ;;  %v1985_v56 = vadd.f32 %v1981_v52, %v1909_v55 }
0x2a0c   :  { %v2581_v54 = vpop.f32.mrf.mxu0 }
0x2a0d   :  { %1994 = vrot.lane.b32.xlu0 %v1992_v53, %s2707_s15  ;;  %v2269_v57 = vmul.f32 -1.442695, %v1985_v56 }
0x2a0f   :  { %2693 = vpow2.f32 %v2269_v57 }
0x2a1c   :  { %v2694_v15 = vpop.eup %2693 }
0x2a1d   :  { %v1989_v58 = vadd.f32 1.0, %v2694_v15 }
0x2a1f   :  { %2695 = vrcp.f32 %v1989_v58 }
0x2a2c   :  { %v2696_v59 = vpop.eup %2695 }
0x2a7f   :  { %v1995_v60 = vpop.permute.xlu0 %1994 }
0x2a80   :  { %v1997_v61 = vmul.f32 %v2696_v59, %v1995_v60 }
0x2a82   :  { %1999 = vrot.lane.b32.xlu1 %v1997_v61, %s2707_s15 }
0x2af4   :  { %v2000_v62 = vpop.permute.xlu1 %1999 }
0x2af5   :  { %v2002_v63 = vadd.f32 %v2000_v62, %v1909_v55 }
0x2af7   :  { %2697 = vtanh.f32 %v2002_v63 }
0x2b04   :  { %v2698_v1 = vpop.eup %2697 }
0x2b05   :  { %v2004_v3 = vsub.f32 %v1908_v50, %v2698_v1 }
0x2b07   :  { %2006 = vrot.lane.b32.xlu0 %v2004_v3, %s2709_s16 }
0x2b79   :  { %v2007_v5 = vpop.permute.xlu0 %2006 }
0x2b7a   :  { %v2009_v6 = vmul.f32 %v2696_v59, %v2007_v5 }
0x2b7c   :  { %2011 = vrot.lane.b32.xlu1 %v2009_v6, %s2708_s3 }
0x2bee   :  { %v2012_v8 = vpop.permute.xlu1 %2011 }
0x2bef   :  { %v2014_v10 = vadd.f32 %v2698_v1, %v2012_v8 }
0x2bf1   :  { %2017 = vrot.lane.b32.xlu0 %v2014_v10, %s2707_s15 }
0x2c63   :  { %v2018_v11 = vpop.permute.xlu0 %2017 }
0x2c64   :  { %2591 = vmatmul.mubr.msk.f32.vlgmr.msra.gmra.mxu1 %vm42_vm0, %v2018_v11 }
0x2d24   :  { %v2087_v13 = vpop.f32.mrf.mxu1 }
0x2d25   :  { %v2098_v14 = vadd.f32 %v2087_v13, %v3095_v27  ;;  %v2091_v18 = vadd.f32 %v2087_v13, %v2015_v17 }
0x2d26   :  { %v2592_v16 = vpop.f32.mrf.mxu1 }
0x2d27   :  { %2100 = vrot.lane.b32.xlu1 %v2098_v14, %s2707_s15  ;;  %v2271_v21 = vmul.f32 -1.442695, %v2091_v18 }
0x2d29   :  { %2699 = vpow2.f32 %v2271_v21 }
0x2d36   :  { %v2700_v22 = vpop.eup %2699 }
0x2d37   :  { %v2095_v23 = vadd.f32 1.0, %v2700_v22 }
0x2d39   :  { %2701 = vrcp.f32 %v2095_v23 }
0x2d46   :  { %v2702_v24 = vpop.eup %2701 }
0x2d99   :  { %v2101_v4 = vpop.permute.xlu1 %2100 }
0x2d9a   :  { %v2103_v25 = vmul.f32 %v2702_v24, %v2101_v4 }
0x2d9c   :  { %2105 = vrot.lane.b32.xlu0 %v2103_v25, %s2707_s15 }
0x2e0e   :  { %v2106_v7 = vpop.permute.xlu0 %2105 }
0x2e0f   :  { %v2108_v26 = vadd.f32 %v2106_v7, %v2015_v17 }
0x2e11   :  { %2703 = vtanh.f32 %v2108_v26 }
0x2e1e   :  { %v2704_v9 = vpop.eup %2703 }
0x2e1f   :  { %v2110_v27 = vsub.f32 %v2014_v10, %v2704_v9 }
0x2e21   :  { %2112 = vrot.lane.b32.xlu1 %v2110_v27, %s2709_s16 }
0x2e93   :  { %v2113_v28 = vpop.permute.xlu1 %2112 }
0x2e94   :  { %v2115_v29 = vmul.f32 %v2702_v24, %v2113_v28 }
0x2e96   :  { %2117 = vrot.lane.b32.xlu0 %v2115_v29, %s2708_s3 }
0x2f08   :  { %v2118_v49 = vpop.permute.xlu0 %2117 }
0x2f09   :  { %v2120_v34 = vadd.f32 %v2704_v9, %v2118_v49 }
0x2f0b   :  { %2122 = vrot.lane.b32.xlu1 %v2120_v34, %s2707_s15 }
0x2f7d   :  { %v2123_v35 = vpop.permute.xlu1 %2122 }
0x2f7e   :  { %2125 = vst.msk [vmem:[#allocation2 + $0x8] sm:$0xff] %vm42_vm0, %v2123_v35 }
0x2f85   :  { %v2129_v36 = vld [vmem:[#allocation2 + $0x8] sm:$0xff] }
0x2f86   :  { %2602 = vmatmul.mubr.msk.f32.vlgmr.msra.gmra.mxu0 %vm42_vm0, %v2129_v36 }
0x3046   :  { %v2210_v12 = vpop.f32.mrf.mxu0 }
0x3047   :  { %v2211_v38 = vadd.f32 %v2272_v37, %v2210_v12 }
0x3048   :  { %v2603_v39 = vpop.f32.mrf.mxu0 }
0x3049   :  { %2215 = vst.msk [vmem:[%s3254_s11] sm:$0xff] %vm2214_vm4, %v2211_v38 }

</bundles_post_ra>
